<compile_context>
chip_gen: v7x
topology: tpu7x:2x2x1
jax: 0.10.0
libtpu: 0.0.40
codegen_flags: <defaults>
</compile_context>

<pallas_src>
import functools

import jax
import jax.numpy as jnp
import numpy as np
from jax.experimental import pallas as pl
from jax.experimental.pallas import tpu as pltpu

ALPHA = 40.0
BETA = 2.0
MARGIN = 0.5        # unused by the hard_mining=None forward path (kept for parity)
_NEG_INIT = -1e30   # finite "minus infinity" for the running maxes


def _round_up(a, b):
    return (a + b - 1) // b * b


def _pick_tile(n, d):
    """Largest tile (<= 512, multiple of 128) keeping >= 2 (ideally even) row
    blocks (v7x megacore) and fitting comfortably in scoped VMEM."""
    tile = 128
    for t in (512, 256):
        nb = _round_up(n, t) // t
        if nb >= 2 and nb % 2 == 0:
            tile = t
            break
    else:
        for t in (512, 256, 128):
            if _round_up(n, t) // t >= 2:
                tile = t
                break
    # crude VMEM guard: double-buffered bf16 X blocks + ~8 live (T, T) f32 temps
    while tile > 128 and (4 * tile * d * 2 + 8 * tile * tile * 4) > 40 * 2**20:
        tile //= 2
    return tile


def lifted_structure_kernel(xj_ref, xi_ref, tj_ref, ti_ref, o_ref,
                            m_pos, m_neg, pos_acc, neg_acc, cnt_acc):
    j = pl.program_id(1)

    @pl.when(j == 0)
    def _init():
        m_pos[...] = jnp.full_like(m_pos, _NEG_INIT)
        m_neg[...] = jnp.full_like(m_neg, _NEG_INIT)
        pos_acc[...] = jnp.zeros_like(pos_acc)
        neg_acc[...] = jnp.zeros_like(neg_acc)
        cnt_acc[...] = jnp.zeros_like(cnt_acc)

    # (Tj, Ti) transposed sim block: contract the feature axis of both bf16
    # operands on the MXU (f32 accumulation).  Output rows (block i) sit on the
    # lane axis, so all per-row state below is lane-dense (1, Ti).
    sim = jax.lax.dot_general(
        xj_ref[...], xi_ref[...],
        dimension_numbers=(((1,), (1,)), ((), ())),
        preferred_element_type=jnp.float32)

    tj = tj_ref[...]                      # (Tj, 1) labels of the reduction block
    ti = ti_ref[...]                      # (1, Ti) labels of the output block
    same = tj == ti                       # (Tj, Ti) same-label mask
    valid_j = tj >= 0                     # padded rows carry label -1
    pos_mask = jnp.logical_and(jnp.logical_and(same, sim < 1.0), valid_j)
    neg_mask = jnp.logical_and(jnp.logical_not(same), valid_j)

    # Per-arm, per-row running maxes (flash style).  Separate pos/neg maxes keep
    # both log-sum-exps exact even when alpha*sim is huge (unnormalized inputs).
    arg = jnp.where(same, -BETA * sim, ALPHA * sim)
    tile_mp = jnp.max(jnp.where(pos_mask, arg, _NEG_INIT), axis=0, keepdims=True)
    tile_mn = jnp.max(jnp.where(neg_mask, arg, _NEG_INIT), axis=0, keepdims=True)
    mp_new = jnp.maximum(m_pos[...], tile_mp)
    mn_new = jnp.maximum(m_neg[...], tile_mn)
    corr_p = jnp.exp(m_pos[...] - mp_new)          # (1, Ti) rescales, cheap
    corr_n = jnp.exp(m_neg[...] - mn_new)

    # ONE exp per element: pos/neg masks are disjoint, each element is shifted
    # by the max of its own arm.  Masked-out elements may overflow to +inf; the
    # jnp.where selects below discard them without producing NaNs.
    e = jnp.exp(arg - jnp.where(same, mp_new, mn_new))
    pos_acc[...] = corr_p * pos_acc[...] + jnp.sum(
        jnp.where(pos_mask, e, 0.0), axis=0, keepdims=True)
    neg_acc[...] = corr_n * neg_acc[...] + jnp.sum(
        jnp.where(neg_mask, e, 0.0), axis=0, keepdims=True)
    # negative-pair count accumulated in-kernel (rides the idle XLU slot)
    cnt_acc[...] += jnp.sum(neg_mask.astype(jnp.float32), axis=0, keepdims=True)
    m_pos[...] = mp_new
    m_neg[...] = mn_new

    @pl.when(j == pl.num_programs(1) - 1)
    def _finalize():
        pos_loss = (2.0 / BETA) * (m_pos[...] + jnp.log(pos_acc[...]))
        neg_loss = (2.0 / ALPHA) * (m_neg[...] + jnp.log(neg_acc[...]))
        # rows with no negative pair are skipped ("continue") in the reference;
        # padded rows (label -1) are zeroed as well.
        keep = jnp.logical_and(cnt_acc[...] > 0.0, ti_ref[...] >= 0)
        o_ref[...] = jnp.where(keep, pos_loss + neg_loss, 0.0)[None]


@functools.partial(jax.jit, static_argnames=("tile",))
def lifted_structure_loss(inputs, targets, *, tile=None):
    """inputs: (N, D) float, targets: (N,) int -> scalar f32 loss."""
    n, d = inputs.shape
    if tile is None:
        tile = _pick_tile(n, d)
    if tile % 128 != 0:
        raise ValueError("tile must be a multiple of 128")
    n_pad = _round_up(n, tile)
    nb = n_pad // tile

    x = jnp.zeros((n_pad, d), jnp.float32).at[:n].set(inputs.astype(jnp.float32))
    x_bf16 = x.astype(jnp.bfloat16)          # bf16 MXU operands, f32 accumulation

    t = jnp.full((n_pad,), -1, jnp.int32).at[:n].set(targets.astype(jnp.int32))
    t_col = t.reshape(n_pad, 1)              # reduction-block labels (column)
    t_row = t.reshape(1, n_pad)              # output-block labels (lane-dense)

    per_block = pl.pallas_call(
        lifted_structure_kernel,
        out_shape=jax.ShapeDtypeStruct((nb, 1, tile), jnp.float32),
        grid_spec=pltpu.PrefetchScalarGridSpec(
            num_scalar_prefetch=0,
            grid=(nb, nb),                    # (row blocks, reduction blocks)
            in_specs=[
                pl.BlockSpec((tile, d), lambda i, j: (j, 0)),   # X_j (reduction)
                pl.BlockSpec((tile, d), lambda i, j: (i, 0)),   # X_i (output rows)
                pl.BlockSpec((tile, 1), lambda i, j: (j, 0)),   # labels of block j
                pl.BlockSpec((1, tile), lambda i, j: (0, i)),   # labels of block i
            ],
            out_specs=pl.BlockSpec((1, 1, tile), lambda i, j: (i, 0, 0)),
            scratch_shapes=[pltpu.VMEM((1, tile), jnp.float32)] * 5,
        ),
        compiler_params=pltpu.CompilerParams(
            dimension_semantics=("parallel", "arbitrary"),
            vmem_limit_bytes=(48 * 2**20 if tile >= 512 else None)),
    )(x_bf16, x_bf16, t_col, t_row)

    per_row = per_block.reshape(-1)[:n]
    return jnp.sum(per_row) / jnp.float32(n)


def _reference_numpy(inputs, targets):
    """float64 numpy mirror of the PyTorch forward (hard_mining=None)."""
    x = np.asarray(inputs, dtype=np.float64)
    t = np.asarray(targets)
    n = x.shape[0]
    sim = x @ x.T
    losses = []
    for i in range(n):
        pos = sim[i][t == t[i]]
        pos = pos[pos < 1]
        neg = sim[i][t != t[i]]
        pos_loss = 2.0 / BETA * np.log(np.sum(np.exp(-BETA * pos)))
        neg_loss = 2.0 / ALPHA * np.log(np.sum(np.exp(ALPHA * neg)))
        if len(neg) == 0:
            continue
        losses.append(pos_loss + neg_loss)
    return np.sum(losses) / n


if __name__ == "__main__":
    key = jax.random.PRNGKey(0)
    k_x, k_t = jax.random.split(key)

    N, D = 200, 32
    base = jax.random.normal(k_x, (N, D), dtype=jnp.float32)
    targets = jax.random.randint(k_t, (N,), 0, 4, dtype=jnp.int32)

    # Two configs:
    #   scale=0.1, auto tile (=128 -> 2x2 grid): small-magnitude sims, exercises
    #     tiling, padding (200 -> 256) and the skipped-row / padded-row gating.
    #   scale=0.4, tile=256 (single block): unnormalized embeddings where
    #     alpha*sim exceeds the naive f32 exp range -> validates the separate
    #     per-arm running maxes (the previous shared-max scheme would underflow
    #     the positive accumulator here).
    for scale, tile in ((0.1, None), (0.4, 256)):
        inputs = scale * base
        loss = lifted_structure_loss(inputs, targets, tile=tile)
        loss = jax.block_until_ready(loss)

        # The kernel feeds the MXU bf16 operands (f32 accumulation), so validate
        # against a float64 reference computed from the same bf16-rounded inputs.
        x_bf16 = np.asarray(inputs.astype(jnp.bfloat16).astype(jnp.float32))
        ref = _reference_numpy(x_bf16, np.asarray(targets))
        np.testing.assert_allclose(np.asarray(loss), ref, rtol=1e-3, atol=5e-4)

    print("KERNEL_OK")
</pallas_src>

<mosaic_0001>
module attributes {stable_mosaic.version = 11 : i64} {
  func.func @lifted_structure_kernel(%arg0: i32, %arg1: i32, %arg2: memref<128x32xbf16, #tpu.memory_space<vmem>>, %arg3: memref<128x32xbf16, #tpu.memory_space<vmem>>, %arg4: memref<128x1xi32, #tpu.memory_space<vmem>>, %arg5: memref<1x128xi32, #tpu.memory_space<vmem>>, %arg6: memref<1x1x128xf32, #tpu.memory_space<vmem>>, %arg7: memref<1x128xf32, #tpu.memory_space<vmem>>, %arg8: memref<1x128xf32, #tpu.memory_space<vmem>>, %arg9: memref<1x128xf32, #tpu.memory_space<vmem>>, %arg10: memref<1x128xf32, #tpu.memory_space<vmem>>, %arg11: memref<1x128xf32, #tpu.memory_space<vmem>>) attributes {dimension_semantics = [#tpu.dimension_semantics<parallel>, #tpu.dimension_semantics<arbitrary>], iteration_bounds = array<i64: 2, 2>, scalar_prefetch = 0 : i64, scratch_operands = 5 : i64, tpu.core_type = #tpu.core_type<tc>, window_params = [{transform_indices = @transform_0, window_bounds = array<i64: 128, 32>}, {transform_indices = @transform_1, window_bounds = array<i64: 128, 32>}, {transform_indices = @transform_2, window_bounds = array<i64: 128, 1>}, {transform_indices = @transform_3, window_bounds = array<i64: 1, 128>}, {transform_indices = @transform_4, window_bounds = array<i64: 1, 1, 128>}]} {
    %c0_i32 = arith.constant 0 : i32
    %0 = arith.cmpi eq, %arg1, %c0_i32 : i32
    %1 = arith.extui %0 : i1 to i32
    %c0_i32_0 = arith.constant 0 : i32
    %2 = arith.cmpi ne, %1, %c0_i32_0 : i32
    scf.if %2 {
      %cst_47 = arith.constant -1.000000e+30 : f32
      %79 = vector.broadcast %cst_47 : f32 to vector<1x128xf32>
      %c0_48 = arith.constant 0 : index
      %c0_49 = arith.constant 0 : index
      %80 = vector.load %arg7[%c0_48, %c0_49] : memref<1x128xf32, #tpu.memory_space<vmem>>, vector<1x128xf32>
      tpu.vector_store %arg7[%c0_48, %c0_49], %79 {strides = array<i32>} : memref<1x128xf32, #tpu.memory_space<vmem>>, vector<1x128xf32>,
      %cst_50 = arith.constant -1.000000e+30 : f32
      %81 = vector.broadcast %cst_50 : f32 to vector<1x128xf32>
      %c0_51 = arith.constant 0 : index
      %c0_52 = arith.constant 0 : index
      %82 = vector.load %arg8[%c0_51, %c0_52] : memref<1x128xf32, #tpu.memory_space<vmem>>, vector<1x128xf32>
      tpu.vector_store %arg8[%c0_51, %c0_52], %81 {strides = array<i32>} : memref<1x128xf32, #tpu.memory_space<vmem>>, vector<1x128xf32>,
      %cst_53 = arith.constant 0.000000e+00 : f32
      %83 = vector.broadcast %cst_53 : f32 to vector<1x128xf32>
      %c0_54 = arith.constant 0 : index
      %c0_55 = arith.constant 0 : index
      %84 = vector.load %arg9[%c0_54, %c0_55] : memref<1x128xf32, #tpu.memory_space<vmem>>, vector<1x128xf32>
      tpu.vector_store %arg9[%c0_54, %c0_55], %83 {strides = array<i32>} : memref<1x128xf32, #tpu.memory_space<vmem>>, vector<1x128xf32>,
      %cst_56 = arith.constant 0.000000e+00 : f32
      %85 = vector.broadcast %cst_56 : f32 to vector<1x128xf32>
      %c0_57 = arith.constant 0 : index
      %c0_58 = arith.constant 0 : index
      %86 = vector.load %arg10[%c0_57, %c0_58] : memref<1x128xf32, #tpu.memory_space<vmem>>, vector<1x128xf32>
      tpu.vector_store %arg10[%c0_57, %c0_58], %85 {strides = array<i32>} : memref<1x128xf32, #tpu.memory_space<vmem>>, vector<1x128xf32>,
      %cst_59 = arith.constant 0.000000e+00 : f32
      %87 = vector.broadcast %cst_59 : f32 to vector<1x128xf32>
      %c0_60 = arith.constant 0 : index
      %c0_61 = arith.constant 0 : index
      %88 = vector.load %arg11[%c0_60, %c0_61] : memref<1x128xf32, #tpu.memory_space<vmem>>, vector<1x128xf32>
      tpu.vector_store %arg11[%c0_60, %c0_61], %87 {strides = array<i32>} : memref<1x128xf32, #tpu.memory_space<vmem>>, vector<1x128xf32>,
    } else {
    }
    %c0 = arith.constant 0 : index
    %c0_1 = arith.constant 0 : index
    %3 = vector.load %arg2[%c0, %c0_1] : memref<128x32xbf16, #tpu.memory_space<vmem>>, vector<128x32xbf16>
    %c0_2 = arith.constant 0 : index
    %c0_3 = arith.constant 0 : index
    %4 = vector.load %arg3[%c0_2, %c0_3] : memref<128x32xbf16, #tpu.memory_space<vmem>>, vector<128x32xbf16>
    %cst = arith.constant dense<0.000000e+00> : vector<128x128xf32>
    %5 = tpu.matmul %3, %4, %cst {dimension_numbers = #tpu.dot_dimension_numbers<[1], [1], [0], [0], [0, 0, 1, 0], [], []>} : vector<128x32xbf16>, vector<128x32xbf16>, vector<128x128xf32> -> vector<128x128xf32>
    %c0_4 = arith.constant 0 : index
    %c0_5 = arith.constant 0 : index
    %6 = vector.load %arg4[%c0_4, %c0_5] : memref<128x1xi32, #tpu.memory_space<vmem>>, vector<128x1xi32>
    %c0_6 = arith.constant 0 : index
    %c0_7 = arith.constant 0 : index
    %7 = vector.load %arg5[%c0_6, %c0_7] : memref<1x128xi32, #tpu.memory_space<vmem>>, vector<1x128xi32>
    %8 = vector.broadcast %6 : vector<128x1xi32> to vector<128x128xi32>
    %9 = vector.broadcast %7 : vector<1x128xi32> to vector<128x128xi32>
    %10 = arith.cmpi eq, %8, %9 : vector<128x128xi32>
    %c0_i32_8 = arith.constant 0 : i32
    %11 = vector.broadcast %c0_i32_8 : i32 to vector<128x1xi32>
    %12 = arith.cmpi sge, %6, %11 : vector<128x1xi32>
    %cst_9 = arith.constant 1.000000e+00 : f32
    %13 = vector.broadcast %cst_9 : f32 to vector<128x128xf32>
    %14 = arith.cmpf olt, %5, %13 : vector<128x128xf32>
    %15 = arith.andi %10, %14 : vector<128x128xi1>
    %16 = vector.broadcast %12 : vector<128x1xi1> to vector<128x128xi1>
    %17 = arith.andi %15, %16 : vector<128x128xi1>
    %cst_10 = arith.constant dense<true> : vector<128x128xi1>
    %18 = arith.xori %10, %cst_10 : vector<128x128xi1>
    %19 = vector.broadcast %12 : vector<128x1xi1> to vector<128x128xi1>
    %20 = arith.andi %18, %19 : vector<128x128xi1>
    %cst_11 = arith.constant -2.000000e+00 : f32
    %21 = vector.broadcast %cst_11 : f32 to vector<128x128xf32>
    %22 = arith.mulf %21, %5 : vector<128x128xf32>
    %cst_12 = arith.constant 4.000000e+01 : f32
    %23 = vector.broadcast %cst_12 : f32 to vector<128x128xf32>
    %24 = arith.mulf %23, %5 : vector<128x128xf32>
    %25 = arith.select %10, %22, %24 : vector<128x128xi1>, vector<128x128xf32>
    %cst_13 = arith.constant -1.000000e+30 : f32
    %26 = vector.broadcast %cst_13 : f32 to vector<128x128xf32>
    %27 = arith.select %17, %25, %26 : vector<128x128xi1>, vector<128x128xf32>
    %cst_14 = arith.constant dense<0xFF800000> : vector<128xf32>
    %28 = vector.multi_reduction <maximumf>, %27, %cst_14 [0] : vector<128x128xf32> to vector<128xf32>
    %29 = vector.shape_cast %28 : vector<128xf32> to vector<1x128xf32>
    %cst_15 = arith.constant -1.000000e+30 : f32
    %30 = vector.broadcast %cst_15 : f32 to vector<128x128xf32>
    %31 = arith.select %20, %25, %30 : vector<128x128xi1>, vector<128x128xf32>
    %cst_16 = arith.constant dense<0xFF800000> : vector<128xf32>
    %32 = vector.multi_reduction <maximumf>, %31, %cst_16 [0] : vector<128x128xf32> to vector<128xf32>
    %33 = vector.shape_cast %32 : vector<128xf32> to vector<1x128xf32>
    %c0_17 = arith.constant 0 : index
    %c0_18 = arith.constant 0 : index
    %34 = vector.load %arg7[%c0_17, %c0_18] : memref<1x128xf32, #tpu.memory_space<vmem>>, vector<1x128xf32>
    %35 = arith.maximumf %34, %29 : vector<1x128xf32>
    %c0_19 = arith.constant 0 : index
    %c0_20 = arith.constant 0 : index
    %36 = vector.load %arg8[%c0_19, %c0_20] : memref<1x128xf32, #tpu.memory_space<vmem>>, vector<1x128xf32>
    %37 = arith.maximumf %36, %33 : vector<1x128xf32>
    %c0_21 = arith.constant 0 : index
    %c0_22 = arith.constant 0 : index
    %38 = vector.load %arg7[%c0_21, %c0_22] : memref<1x128xf32, #tpu.memory_space<vmem>>, vector<1x128xf32>
    %39 = arith.subf %38, %35 : vector<1x128xf32>
    %40 = math.exp %39 : vector<1x128xf32>
    %c0_23 = arith.constant 0 : index
    %c0_24 = arith.constant 0 : index
    %41 = vector.load %arg8[%c0_23, %c0_24] : memref<1x128xf32, #tpu.memory_space<vmem>>, vector<1x128xf32>
    %42 = arith.subf %41, %37 : vector<1x128xf32>
    %43 = math.exp %42 : vector<1x128xf32>
    %44 = vector.shape_cast %35 : vector<1x128xf32> to vector<1x128xf32>
    %45 = vector.broadcast %44 : vector<1x128xf32> to vector<128x128xf32>
    %46 = vector.shape_cast %37 : vector<1x128xf32> to vector<1x128xf32>
    %47 = vector.broadcast %46 : vector<1x128xf32> to vector<128x128xf32>
    %48 = arith.select %10, %45, %47 : vector<128x128xi1>, vector<128x128xf32>
    %49 = arith.subf %25, %48 : vector<128x128xf32>
    %50 = math.exp %49 : vector<128x128xf32>
    %c0_25 = arith.constant 0 : index
    %c0_26 = arith.constant 0 : index
    %51 = vector.load %arg9[%c0_25, %c0_26] : memref<1x128xf32, #tpu.memory_space<vmem>>, vector<1x128xf32>
    %52 = arith.mulf %40, %51 : vector<1x128xf32>
    %cst_27 = arith.constant 0.000000e+00 : f32
    %53 = vector.broadcast %cst_27 : f32 to vector<128x128xf32>
    %54 = arith.select %17, %50, %53 : vector<128x128xi1>, vector<128x128xf32>
    %cst_28 = arith.constant dense<0.000000e+00> : vector<128xf32>
    %55 = vector.multi_reduction <add>, %54, %cst_28 [0] : vector<128x128xf32> to vector<128xf32>
    %56 = vector.shape_cast %55 : vector<128xf32> to vector<1x128xf32>
    %57 = arith.addf %52, %56 : vector<1x128xf32>
    %c0_29 = arith.constant 0 : index
    %c0_30 = arith.constant 0 : index
    %58 = vector.load %arg9[%c0_29, %c0_30] : memref<1x128xf32, #tpu.memory_space<vmem>>, vector<1x128xf32>
    tpu.vector_store %arg9[%c0_29, %c0_30], %57 {strides = array<i32>} : memref<1x128xf32, #tpu.memory_space<vmem>>, vector<1x128xf32>,
    %c0_31 = arith.constant 0 : index
    %c0_32 = arith.constant 0 : index
    %59 = vector.load %arg10[%c0_31, %c0_32] : memref<1x128xf32, #tpu.memory_space<vmem>>, vector<1x128xf32>
    %60 = arith.mulf %43, %59 : vector<1x128xf32>
    %cst_33 = arith.constant 0.000000e+00 : f32
    %61 = vector.broadcast %cst_33 : f32 to vector<128x128xf32>
    %62 = arith.select %20, %50, %61 : vector<128x128xi1>, vector<128x128xf32>
    %cst_34 = arith.constant dense<0.000000e+00> : vector<128xf32>
    %63 = vector.multi_reduction <add>, %62, %cst_34 [0] : vector<128x128xf32> to vector<128xf32>
    %64 = vector.shape_cast %63 : vector<128xf32> to vector<1x128xf32>
    %65 = arith.addf %60, %64 : vector<1x128xf32>
    %c0_35 = arith.constant 0 : index
    %c0_36 = arith.constant 0 : index
    %66 = vector.load %arg10[%c0_35, %c0_36] : memref<1x128xf32, #tpu.memory_space<vmem>>, vector<1x128xf32>
    tpu.vector_store %arg10[%c0_35, %c0_36], %65 {strides = array<i32>} : memref<1x128xf32, #tpu.memory_space<vmem>>, vector<1x128xf32>,
    %c0_37 = arith.constant 0 : index
    %c0_38 = arith.constant 0 : index
    %67 = vector.load %arg11[%c0_37, %c0_38] : memref<1x128xf32, #tpu.memory_space<vmem>>, vector<1x128xf32>
    %68 = arith.extui %20 : vector<128x128xi1> to vector<128x128xi32>
    %69 = arith.sitofp %68 : vector<128x128xi32> to vector<128x128xf32>
    %cst_39 = arith.constant dense<0.000000e+00> : vector<128xf32>
    %70 = vector.multi_reduction <add>, %69, %cst_39 [0] : vector<128x128xf32> to vector<128xf32>
    %71 = vector.shape_cast %70 : vector<128xf32> to vector<1x128xf32>
    %72 = arith.addf %67, %71 : vector<1x128xf32>
    %c0_40 = arith.constant 0 : index
    %c0_41 = arith.constant 0 : index
    %73 = vector.load %arg11[%c0_40, %c0_41] : memref<1x128xf32, #tpu.memory_space<vmem>>, vector<1x128xf32>
    tpu.vector_store %arg11[%c0_40, %c0_41], %72 {strides = array<i32>} : memref<1x128xf32, #tpu.memory_space<vmem>>, vector<1x128xf32>,
    %c0_42 = arith.constant 0 : index
    %c0_43 = arith.constant 0 : index
    %74 = vector.load %arg7[%c0_42, %c0_43] : memref<1x128xf32, #tpu.memory_space<vmem>>, vector<1x128xf32>
    tpu.vector_store %arg7[%c0_42, %c0_43], %35 {strides = array<i32>} : memref<1x128xf32, #tpu.memory_space<vmem>>, vector<1x128xf32>,
    %c0_44 = arith.constant 0 : index
    %c0_45 = arith.constant 0 : index
    %75 = vector.load %arg8[%c0_44, %c0_45] : memref<1x128xf32, #tpu.memory_space<vmem>>, vector<1x128xf32>
    tpu.vector_store %arg8[%c0_44, %c0_45], %37 {strides = array<i32>} : memref<1x128xf32, #tpu.memory_space<vmem>>, vector<1x128xf32>,
    %c1_i32 = arith.constant 1 : i32
    %76 = arith.cmpi eq, %arg1, %c1_i32 : i32
    %77 = arith.extui %76 : i1 to i32
    %c0_i32_46 = arith.constant 0 : i32
    %78 = arith.cmpi ne, %77, %c0_i32_46 : i32
    scf.if %78 {
      %c0_47 = arith.constant 0 : index
      %c0_48 = arith.constant 0 : index
      %79 = vector.load %arg7[%c0_47, %c0_48] : memref<1x128xf32, #tpu.memory_space<vmem>>, vector<1x128xf32>
      %c0_49 = arith.constant 0 : index
      %c0_50 = arith.constant 0 : index
      %80 = vector.load %arg9[%c0_49, %c0_50] : memref<1x128xf32, #tpu.memory_space<vmem>>, vector<1x128xf32>
      %81 = math.log %80 : vector<1x128xf32>
      %82 = arith.addf %79, %81 : vector<1x128xf32>
      %cst_51 = arith.constant 1.000000e+00 : f32
      %83 = vector.broadcast %cst_51 : f32 to vector<1x128xf32>
      %84 = arith.mulf %83, %82 : vector<1x128xf32>
      %c0_52 = arith.constant 0 : index
      %c0_53 = arith.constant 0 : index
      %85 = vector.load %arg8[%c0_52, %c0_53] : memref<1x128xf32, #tpu.memory_space<vmem>>, vector<1x128xf32>
      %c0_54 = arith.constant 0 : index
      %c0_55 = arith.constant 0 : index
      %86 = vector.load %arg10[%c0_54, %c0_55] : memref<1x128xf32, #tpu.memory_space<vmem>>, vector<1x128xf32>
      %87 = math.log %86 : vector<1x128xf32>
      %88 = arith.addf %85, %87 : vector<1x128xf32>
      %cst_56 = arith.constant 5.000000e-02 : f32
      %89 = vector.broadcast %cst_56 : f32 to vector<1x128xf32>
      %90 = arith.mulf %89, %88 : vector<1x128xf32>
      %c0_57 = arith.constant 0 : index
      %c0_58 = arith.constant 0 : index
      %91 = vector.load %arg11[%c0_57, %c0_58] : memref<1x128xf32, #tpu.memory_space<vmem>>, vector<1x128xf32>
      %cst_59 = arith.constant 0.000000e+00 : f32
      %92 = vector.broadcast %cst_59 : f32 to vector<1x128xf32>
      %93 = arith.cmpf ogt, %91, %92 : vector<1x128xf32>
      %c0_60 = arith.constant 0 : index
      %c0_61 = arith.constant 0 : index
      %94 = vector.load %arg5[%c0_60, %c0_61] : memref<1x128xi32, #tpu.memory_space<vmem>>, vector<1x128xi32>
      %c0_i32_62 = arith.constant 0 : i32
      %95 = vector.broadcast %c0_i32_62 : i32 to vector<1x128xi32>
      %96 = arith.cmpi sge, %94, %95 : vector<1x128xi32>
      %97 = arith.andi %93, %96 : vector<1x128xi1>
      %98 = arith.addf %84, %90 : vector<1x128xf32>
      %cst_63 = arith.constant 0.000000e+00 : f32
      %99 = vector.broadcast %cst_63 : f32 to vector<1x128xf32>
      %100 = arith.select %97, %98, %99 : vector<1x128xi1>, vector<1x128xf32>
      %101 = vector.shape_cast %100 : vector<1x128xf32> to vector<1x1x128xf32>
      %c0_64 = arith.constant 0 : index
      %c0_65 = arith.constant 0 : index
      %c0_66 = arith.constant 0 : index
      %102 = vector.load %arg6[%c0_64, %c0_65, %c0_66] : memref<1x1x128xf32, #tpu.memory_space<vmem>>, vector<1x1x128xf32>
      tpu.vector_store %arg6[%c0_64, %c0_65, %c0_66], %101 {strides = array<i32>} : memref<1x1x128xf32, #tpu.memory_space<vmem>>, vector<1x1x128xf32>,
    } else {
    }
    return
  }
  func.func @transform_0(%arg0: i32, %arg1: i32) -> (i32, i32) {
    %c0_i32 = arith.constant 0 : i32
    %c0_i32_0 = arith.constant 0 : i32
    return %arg1, %c0_i32 : i32, i32
  }
  func.func @transform_1(%arg0: i32, %arg1: i32) -> (i32, i32) {
    %c0_i32 = arith.constant 0 : i32
    %c0_i32_0 = arith.constant 0 : i32
    return %arg0, %c0_i32 : i32, i32
  }
  func.func @transform_2(%arg0: i32, %arg1: i32) -> (i32, i32) {
    %c0_i32 = arith.constant 0 : i32
    %c0_i32_0 = arith.constant 0 : i32
    return %arg1, %c0_i32 : i32, i32
  }
  func.func @transform_3(%arg0: i32, %arg1: i32) -> (i32, i32) {
    %c0_i32 = arith.constant 0 : i32
    %c0_i32_0 = arith.constant 0 : i32
    return %c0_i32, %arg0 : i32, i32
  }
  func.func @transform_4(%arg0: i32, %arg1: i32) -> (i32, i32, i32) {
    %c0_i32 = arith.constant 0 : i32
    %c0_i32_0 = arith.constant 0 : i32
    %c0_i32_1 = arith.constant 0 : i32
    return %arg0, %c0_i32, %c0_i32_0 : i32, i32, i32
  }
}

</mosaic_0001>

<bundles_post_ra>
// kernel: lifted_structure_loss.1
= control target key start
LH: loop header
LB: loop body
LE: loop exit
PB: predicated region body
PF: predicated region fallthrough
CT: control target
= control target key end

     0   :  { %s1566_s15 = smov 0   ;;  %s1568_s16 = smov 0   ;;  %s2631_s0 = inlined_call_operand.vmem [shape: bf16[256,32], index: 0, kind: input, shape index: {}, may-alias: {0,1}]   ;;  %s2632_s1 = inlined_call_operand.vmem [shape: bf16[256,32], index: 1, kind: input, shape index: {}, may-alias: {0,1}]   ;;  %s2633_s2 = inlined_call_operand.vmem [shape: s32[256,1], index: 2, kind: input, shape index: {}]   ;;  %s2634_s3 = inlined_call_operand.vmem [shape: s32[1,256], index: 3, kind: input, shape index: {}]   ;;  %s2635_s4 = inlined_call_operand.vmem [shape: f32[2,1,128], index: 4, kind: output, shape index: {}]  }
   0x1   :  { %s1570_s17 = smov 0   ;;  %s1572_s18 = smov 0  }
   0x2   :  { %s1574_s19 = smov 0  }
   0x3 LB: > { %s23_s20 = sadd.s32 1, %s1526_s17  ;;  %s26_s21 = sadd.s32 1, %s1530_s18  ;;  %s1534_s19 = sphi %s1574_s19, %s14_s19   ;;  %s1530_s18 = sphi %s1572_s18, %s2963_s18   ;;  %s1526_s17 = sphi %s1570_s17, %s2962_s17   ;;  %s1522_s16 = sphi %s1568_s16, %s2961_s16   ;;  %s1518_s15 = sphi %s1566_s15, %s2960_s15  }
   0x4   : > { %p24_p0 = scmp.ge.s32.totalorder %s23_s20, 2  ;;  %p1261_p1 = scmp.ge.s32.totalorder %s1534_s19, 1 }
   0x5   : > { %p205_p2 = scmp.lt.s32.totalorder %s1534_s19, 5 }
   0x6   : > { %s2965_s20 = smov (%p24_p0, %s23_s20), 0  ;;  %s2967_s21 = smov (!%p24_p0, %s26_s21), %s1530_s18 }
   0x7   : > { %p206_p3 = pnand %p1261_p1, %p205_p2  ;;  %p28_p4 = scmp.ge.s32.totalorder %s2967_s21, 2 }
   0x9   : > { %s2969_s21 = smov (%p28_p4, %s2967_s21), 0  ;;  %209 = sbr.rel (%p206_p3) target bundleno = 477 (0x1dd), region = 36 }
  0x10   : > { %s1262_s22 = sshll.u32 %s1518_s15, 4  ;;  %s1264_s23 = sshll.u32 %s1522_s16, 4 }
  0x11   : > { %p243_p5 = scmp.lt.s32.totalorder %s1262_s22, 31  ;;  %p249_p6 = scmp.lt.s32.totalorder %s1264_s23, 31 }
  0x12   : > { %p260_p7 = scmp.lt.s32.totalorder %s1522_s16, 1  ;;  %p1268_p8 = scmp.ne.s32.totalorder %s1518_s15, 0 }
  0x13   : > { %s2971_s22 = smov (!%p243_p5, %s1262_s22), 31  ;;  %s2973_s23 = smov (!%p249_p6, %s1264_s23), 31 }
  0x14   : > { %s1263_s24 = sshll.u32 %s2971_s22, 2  ;;  %s1267_s25 = sshll.u32 %s2971_s22, 3  ;;  %v1536_v0 = vmov (!%p1268_p8), -1e+30   ;;  %v1537_v1 = vmov (!%p1268_p8), 0.0  }
  0x15   : > { %s1602_s28 = scalar_lea.vmem %s2631_s0, %s1263_s24  ;;  %s1265_s29 = sshll.u32 %s2973_s23, 2  ;;  %271 = vst [vmem:[#allocation2] sm:$0x1] (!%p1268_p8), %v1536_v0  ;;  %272 = vst [vmem:[#allocation3] sm:$0x1] (!%p1268_p8), %v1536_v0 }
  0x16   : > { %s1607_s6 = scalar_lea.vmem %s2632_s1, %s1265_s29  ;;  %s1612_s9 = scalar_lea.vmem %s2633_s2, %s1267_s25  ;;  %273 = vst [vmem:[#allocation4] sm:$0x1] (!%p1268_p8), %v1537_v1  ;;  %274 = vst [vmem:[#allocation5] sm:$0x1] (!%p1268_p8), %v1537_v1 }
  0x17   : > { %s2975_s16 = smov (!%p260_p7, %s1522_s16), 1  ;;  %270 = sbr.rel (%p1268_p8) target bundleno = 30 (0x1e), region = 40 }
  0x18   : > { %s1620_s12 = scalar_lea.vmem %s2634_s3, %s2975_s16  ;;  %s265_s22 = scalar_lea.vmem %s2635_s4, %s2975_s16  ;;  %275 = vst [vmem:[#allocation6] sm:$0x1] (!%p1268_p8), %v1537_v1 }
  0x1e PF: > { %v1440_v2 = vld [vmem:[%s1607_s6] sm:$0xff]   ;;  %vm388_vm0 = vcmask 261120   ;;  %v1441_v3 = vld [vmem:[%s1607_s6 + $0x8] sm:$0xff]   ;;  %v1538_v5 = vmov 0   ;;  %v536_v7 = vld [vmem:[%s1612_s9 + $0x10] sm:$0xff]  ;;  %p1310_p9 = scmp.ne.s32.totalorder %s1518_s15, 1 }
  0x1f   : > { %1377 = vmatprep.subr.msk.bf16.mxu0 %vm388_vm0, %v1440_v2  ;;  %1378 = vmatprep.subr.msk.bf16.mxu1 %vm388_vm0, %v1440_v2  ;;  %v414_v4 = vsel %vm388_vm0, %v1440_v2, 0  ;;  %v534_v6 = vld [vmem:[%s1612_s9] sm:$0xff]  ;;  %v535_v8 = vld [vmem:[%s1612_s9 + $0x8] sm:$0xff]  ;;  %v537_v9 = vld [vmem:[%s1612_s9 + $0x18] sm:$0xff]  ;;  %v417_v10 = vsel %vm388_vm0, %v1441_v3, 0  ;;  %vm621_vm3 = vcmp.ge.s32.totalorder %v536_v7, 0 }
  0x20   : > { %1330 = vmatpush3.bf16.xpose.msra.mxu0 %v414_v4  ;;  %1369 = vmatpush3.bf16.xpose.msra.mxu1 %v414_v4  ;;  %v1442_v11 = vld [vmem:[%s1607_s6 + $0x10] sm:$0xff]   ;;  %v538_v12 = vld [vmem:[%s1612_s9 + $0x20] sm:$0xff]  ;;  %v539_v13 = vld [vmem:[%s1612_s9 + $0x28] sm:$0xff]  ;;  %vm619_vm1 = vcmp.ge.s32.totalorder %v534_v6, 0  ;;  %vm620_vm2 = vcmp.ge.s32.totalorder %v535_v8, 0  ;;  %vm622_vm4 = vcmp.ge.s32.totalorder %v537_v9, 0 }
  0x21   : > { %1379 = vmatprep.subr.msk.bf16.mxu0 %vm388_vm0, %v1441_v3  ;;  %1380 = vmatprep.subr.msk.bf16.mxu1 %vm388_vm0, %v1441_v3  ;;  %v1448_v14 = vld [vmem:[%s1602_s28] sm:$0xff]   ;;  %v1443_v16 = vld [vmem:[%s1607_s6 + $0x18] sm:$0xff]   ;;  %v540_v17 = vld [vmem:[%s1612_s9 + $0x30] sm:$0xff]  ;;  %v420_v18 = vsel %vm388_vm0, %v1442_v11, 0  ;;  %v667_v20 = vsel %vm619_vm1, 1, %v1538_v5  ;;  %v668_v21 = vsel %vm620_vm2, 1, %v1538_v5 }
  0x22   : > { %1438 = vset.pattern.permute.xlu0 %v1538_v5  ;;  %1439 = vset.pattern.permute.xlu1 %v1538_v5  ;;  %v1449_v15 = vld [vmem:[%s1602_s28 + $0x20] sm:$0xff]   ;;  %v541_v19 = vld [vmem:[%s1612_s9 + $0x38] sm:$0xff]  ;;  %v669_v22 = vsel %vm621_vm3, 1, %v1538_v5  ;;  %v670_v23 = vsel %vm622_vm4, 1, %v1538_v5  ;;  %v423_v24 = vsel %vm388_vm0, %v1443_v16, 0  ;;  %vm623_vm5 = vcmp.ge.s32.totalorder %v538_v12, 0 }
  0x23   : > { %552 = vperm.xlu0 %1438, %v534_v6   ;;  %558 = vperm.xlu1 %1439, %v536_v7   ;;  %v1444_v25 = vld [vmem:[%s1607_s6 + $0x20] sm:$0xff]   ;;  %vm624_vm6 = vcmp.ge.s32.totalorder %v539_v13, 0  ;;  %v671_v26 = vsel %vm623_vm5, 1, %v1538_v5  ;;  %vm625_vm7 = vcmp.ge.s32.totalorder %v540_v17, 0  ;;  %vm626_vm8 = vcmp.ge.s32.totalorder %v541_v19, 0  ;;  %v1445_v31 = vld [vmem:[%s1607_s6 + $0x28] sm:$0xff]  }
  0x24   : > { %1345 = vmatprep.mubr.msk.bf16.mxu0 %vm388_vm0, %v1448_v14  ;;  %1353 = vmatprep.mubr.msk.bf16.mxu1 %vm388_vm0, %v1449_v15  ;;  %v672_v27 = vsel %vm624_vm6, 1, %v1538_v5  ;;  %v673_v28 = vsel %vm625_vm7, 1, %v1538_v5  ;;  %v674_v29 = vsel %vm626_vm8, 1, %v1538_v5  ;;  %v426_v30 = vsel %vm388_vm0, %v1444_v25, 0  ;;  %v542_v32 = vld [vmem:[%s1612_s9 + $0x40] sm:$0xff]  ;;  %v543_v33 = vld [vmem:[%s1612_s9 + $0x48] sm:$0xff] }
  0x25   : > { %v544_v34 = vld [vmem:[%s1612_s9 + $0x50] sm:$0xff]  ;;  %v545_v35 = vld [vmem:[%s1612_s9 + $0x58] sm:$0xff]  ;;  %v429_v36 = vsel %vm388_vm0, %v1445_v31, 0  ;;  %vm627_vm9 = vcmp.ge.s32.totalorder %v542_v32, 0  ;;  %vm628_vm10 = vcmp.ge.s32.totalorder %v543_v33, 0  ;;  %v546_v44 = vld [vmem:[%s1612_s9 + $0x60] sm:$0xff] }
  0x26   : > { %v1446_v37 = vld [vmem:[%s1607_s6 + $0x30] sm:$0xff]   ;;  %v675_v38 = vsel %vm627_vm9, 1, %v1538_v5  ;;  %v676_v39 = vsel %vm628_vm10, 1, %v1538_v5  ;;  %vm629_vm11 = vcmp.ge.s32.totalorder %v544_v34, 0  ;;  %vm630_vm12 = vcmp.ge.s32.totalorder %v545_v35, 0  ;;  %v1447_v43 = vld [vmem:[%s1607_s6 + $0x38] sm:$0xff]  }
  0x27   : > { %555 = vperm.xlu0 %1438, %v535_v8   ;;  %561 = vperm.xlu1 %1439, %v537_v9   ;;  %v677_v40 = vsel %vm629_vm11, 1, %v1538_v5  ;;  %v678_v41 = vsel %vm630_vm12, 1, %v1538_v5  ;;  %v432_v42 = vsel %vm388_vm0, %v1446_v37, 0  ;;  %v547_v45 = vld [vmem:[%s1612_s9 + $0x68] sm:$0xff]  ;;  %v548_v46 = vld [vmem:[%s1612_s9 + $0x70] sm:$0xff]  ;;  %v549_v47 = vld [vmem:[%s1612_s9 + $0x78] sm:$0xff] }
  0x28   : > { %1332 = vmatpush3.bf16.xpose.msra.mxu0 %v417_v10  ;;  %1370 = vmatpush3.bf16.xpose.msra.mxu1 %v417_v10  ;;  %v435_v48 = vsel %vm388_vm0, %v1447_v43, 0  ;;  %vm631_vm13 = vcmp.ge.s32.totalorder %v546_v44, 0  ;;  %vm632_vm14 = vcmp.ge.s32.totalorder %v547_v45, 0  ;;  %v1450_v51 = vld [vmem:[%s1602_s28 + $0x8] sm:$0xff]   ;;  %vm633_vm15 = vcmp.ge.s32.totalorder %v548_v46, 0  ;;  %v1452_v53 = vld [vmem:[%s1602_s28 + $0x10] sm:$0xff]  }
  0x29   : > { %1381 = vmatprep.subr.msk.bf16.mxu0 %vm388_vm0, %v1442_v11  ;;  %1382 = vmatprep.subr.msk.bf16.mxu1 %vm388_vm0, %v1442_v11  ;;  %v679_v49 = vsel %vm631_vm13, 1, %v1538_v5  ;;  %v680_v50 = vsel %vm632_vm14, 1, %v1538_v5  ;;  %v1451_v52 = vld [vmem:[%s1602_s28 + $0x28] sm:$0xff]   ;;  %vm634_vm1 = vcmp.ge.s32.totalorder %v549_v47, 0  ;;  %v1453_v54 = vld [vmem:[%s1602_s28 + $0x30] sm:$0xff]   ;;  %v681_v55 = vsel %vm633_vm15, 1, %v1538_v5 }
  0x2a   : > { %v682_v56 = vsel %vm634_vm1, 1, %v1538_v5  ;;  %v1454_v57 = vld [vmem:[%s1602_s28 + $0x18] sm:$0xff]   ;;  %v1722_v1 = vld [vmem:[%s1620_s12] ss:$0 sm:$0xff]  ;;  %vm1539_vm4 = vmmov 1   ;;  %v2732_v7 = vmov 0 }
  0x2b   : > { %564 = vperm.xlu0 %1438, %v538_v12   ;;  %567 = vperm.xlu1 %1439, %v539_v13   ;;  %v1455_v58 = vld [vmem:[%s1602_s28 + $0x38] sm:$0xff]   ;;  %v1540_v8 = vmov 0.0   ;;  %v2735_v10 = vmov 0  ;;  %v2738_v15 = vmov 0 }
  0x2f   : > { %570 = vperm.xlu0 %1438, %v540_v17   ;;  %573 = vperm.xlu1 %1439, %v541_v19   ;;  %v2741_v17 = vmov 0 }
  0x30   : > { %1334 = vmatpush3.bf16.xpose.msra.mxu0 %v420_v18  ;;  %1371 = vmatpush3.bf16.xpose.msra.mxu1 %v420_v18 }
  0x31   : > { %1383 = vmatprep.subr.msk.bf16.mxu0 %vm388_vm0, %v1443_v16  ;;  %1384 = vmatprep.subr.msk.bf16.mxu1 %vm388_vm0, %v1443_v16 }
  0x33   : > { %684 = vperm.xlu0 %1438, %v667_v20   ;;  %687 = vperm.xlu1 %1439, %v668_v21  }
  0x37   : > { %690 = vperm.xlu0 %1438, %v669_v22   ;;  %693 = vperm.xlu1 %1439, %v670_v23   ;;  %v2745_v23 = vmov 0 }
  0x38   : > { %1336 = vmatpush3.bf16.xpose.msra.mxu0 %v423_v24  ;;  %1372 = vmatpush3.bf16.xpose.msra.mxu1 %v423_v24 }
  0x39   : > { %1385 = vmatprep.subr.msk.bf16.mxu0 %vm388_vm0, %v1444_v25  ;;  %1386 = vmatprep.subr.msk.bf16.mxu1 %vm388_vm0, %v1444_v25  ;;  %v2747_v25 = vmov 0 }
  0x3b   : > { %696 = vperm.xlu0 %1438, %v671_v26   ;;  %699 = vperm.xlu1 %1439, %v672_v27  }
  0x3f   : > { %702 = vperm.xlu0 %1438, %v673_v28   ;;  %705 = vperm.xlu1 %1439, %v674_v29  }
  0x40   : > { %1338 = vmatpush3.bf16.xpose.msra.mxu0 %v426_v30  ;;  %1373 = vmatpush3.bf16.xpose.msra.mxu1 %v426_v30  ;;  %v2750_v30 = vmov 0 }
  0x41   : > { %1387 = vmatprep.subr.msk.bf16.mxu0 %vm388_vm0, %v1445_v31  ;;  %1388 = vmatprep.subr.msk.bf16.mxu1 %vm388_vm0, %v1445_v31 }
  0x43   : > { %576 = vperm.xlu0 %1438, %v542_v32   ;;  %579 = vperm.xlu1 %1439, %v543_v33  }
  0x47   : > { %582 = vperm.xlu0 %1438, %v544_v34   ;;  %585 = vperm.xlu1 %1439, %v545_v35   ;;  %v2754_v35 = vmov 0 }
  0x48   : > { %1340 = vmatpush3.bf16.xpose.msra.mxu0 %v429_v36  ;;  %1374 = vmatpush3.bf16.xpose.msra.mxu1 %v429_v36 }
  0x49   : > { %1389 = vmatprep.subr.msk.bf16.mxu0 %vm388_vm0, %v1446_v37  ;;  %1390 = vmatprep.subr.msk.bf16.mxu1 %vm388_vm0, %v1446_v37 }
  0x4b   : > { %708 = vperm.xlu0 %1438, %v675_v38   ;;  %711 = vperm.xlu1 %1439, %v676_v39  }
  0x4f   : > { %714 = vperm.xlu0 %1438, %v677_v40   ;;  %717 = vperm.xlu1 %1439, %v678_v41  }
  0x50   : > { %1342 = vmatpush3.bf16.xpose.msra.mxu0 %v432_v42  ;;  %1375 = vmatpush3.bf16.xpose.msra.mxu1 %v432_v42 }
  0x51   : > { %1391 = vmatprep.subr.msk.bf16.mxu0 %vm388_vm0, %v1447_v43  ;;  %1392 = vmatprep.subr.msk.bf16.mxu1 %vm388_vm0, %v1447_v43  ;;  %v2758_v43 = vmov 0 }
  0x53   : > { %588 = vperm.xlu0 %1438, %v546_v44   ;;  %591 = vperm.xlu1 %1439, %v547_v45   ;;  %v2761_v45 = vmov 0 }
  0x57   : > { %594 = vperm.xlu0 %1438, %v548_v46   ;;  %597 = vperm.xlu1 %1439, %v549_v47  }
  0x58   : > { %1344 = vmatpush3.bf16.xpose.msra.mxu0 %v435_v48  ;;  %1376 = vmatpush3.bf16.xpose.msra.mxu1 %v435_v48 }
  0x5b   : > { %720 = vperm.xlu0 %1438, %v679_v49   ;;  %723 = vperm.xlu1 %1439, %v680_v50   ;;  %v2764_v50 = vmov 0 }
  0x5f   : > { %1346 = vmatmul.mubr.msk.bf16.vlgmr.msra.gmra.mrb[0].mxu0 %vm388_vm0, %v1450_v51  ;;  %1354 = vmatmul.mubr.msk.bf16.vlgmr.msra.gmra.mrb[0].mxu1 %vm388_vm0, %v1451_v52 }
  0x60   : > { %1349 = vmatprep.mubr.msk.bf16.mxu0 %vm388_vm0, %v1452_v53  ;;  %1357 = vmatprep.mubr.msk.bf16.mxu1 %vm388_vm0, %v1453_v54 }
  0x61   : > { %726 = vperm.xlu0 %1438, %v681_v55   ;;  %729 = vperm.xlu1 %1439, %v682_v56   ;;  %v2768_v55 = vmov 0 }
  0x67   : > { %1350 = vmatmul.mubr.msk.bf16.gmra.mrb[4].mxu0 %vm388_vm0, %v1454_v57  ;;  %1358 = vmatmul.mubr.msk.bf16.gmra.mrb[4].mxu1 %vm388_vm0, %v1455_v58 }
  0xa2   : > { %v1709_v59 = vpop.permute.xlu0 %552  ;;  %v1711_v60 = vpop.permute.xlu1 %558 }
  0xa3   : > { %2728 = vst [vmem:[#allocation7_spill] sm:$0xff] %v1709_v59  ;;  %2729 = vst [vmem:[#allocation8_spill] sm:$0xff] %v1711_v60  ;;  %vm2650_vm2 = vcmp.eq.s32.totalorder %v1709_v59, %v1722_v1  ;;  %vm2651_vm3 = vcmp.eq.s32.totalorder %v1711_v60, %v1722_v1 }
  0xa4   : > { %vm763_vm5 = vmxor %vm2650_vm2, %vm1539_vm4 }
  0xa5   : > { %vm1754_vm10 = vmxor %vm2651_vm3, %vm1539_vm4 }
  0xa6   : > { %v1713_v61 = vpop.permute.xlu0 %555  ;;  %v1715_v62 = vpop.permute.xlu1 %561 }
  0xa7   : > { %vm2637_vm0 = vcmp.eq.s32.totalorder %v1713_v61, %v1722_v1  ;;  %vm2641_vm7 = vcmp.eq.s32.totalorder %v1715_v62, %v1722_v1 }
  0xa8   : > { %vm764_vm6 = vmxor %vm2637_vm0, %vm1539_vm4 }
  0xa9   : > { %vm766_vm14 = vmxor %vm2641_vm7, %vm1539_vm4 }
  0xaa   : > { %v1717_v63 = vpop.permute.xlu0 %564  ;;  %v1719_v0 = vpop.permute.xlu1 %567 }
  0xab   : > { %vm2639_vm11 = vcmp.eq.s32.totalorder %v1717_v63, %v1722_v1  ;;  %vm2642_vm15 = vcmp.eq.s32.totalorder %v1719_v0, %v1722_v1 }
  0xae   : > { %v1726_v2 = vpop.permute.xlu0 %570  ;;  %v1728_v3 = vpop.permute.xlu1 %573 }
  0xb2   : > { %v1738_v4 = vpop.permute.xlu0 %684  ;;  %v1740_v5 = vpop.permute.xlu1 %687 }
  0xb3   : > { %vm2638_vm8 = vcmp.eq.s32.totalorder %v1738_v4, 1  ;;  %vm2636_vm9 = vcmp.eq.s32.totalorder %v1740_v5, 1 }
  0xb4   : > { %vm1762_vm12 = vmand %vm763_vm5, %vm2638_vm8 }
  0xb5   : > { %v2733_v7 = vsel %vm1762_vm12, 4294967295, %v2732_v7  ;;  %v1294_v9 = vsel %vm1762_vm12, 1.0, %v1540_v8  ;;  %vm1771_vm13 = vmand %vm764_vm6, %vm2636_vm9  ;;  %vm2643_vm9 = vcmp.eq.s32.totalorder %v1726_v2, %v1722_v1 }
  0xb6   : > { %2734 = vst [vmem:[#allocation9_spill] sm:$0xff] %v2733_v7  ;;  %v2736_v10 = vsel %vm1771_vm13, 4294967295, %v2735_v10  ;;  %v1295_v11 = vsel %vm1771_vm13, 1.0, %v1540_v8  ;;  %v1778_v12 = vpop.permute.xlu0 %690  ;;  %v1784_v13 = vpop.permute.xlu1 %693  ;;  %vm767_vm6 = vmxor %vm2639_vm11, %vm1539_vm4 }
  0xb7   : > { %2737 = vst [vmem:[#allocation10_spill] sm:$0xff] %v2736_v10  ;;  %v1118_v14 = vadd.f32 %v1295_v11, %v1294_v9  ;;  %vm2649_vm1 = vcmp.eq.s32.totalorder %v1778_v12, 1  ;;  %vm2640_vm5 = vcmp.eq.s32.totalorder %v1784_v13, 1 }
  0xb8   : > { %vm1800_vm0 = vmand %vm1754_vm10, %vm2649_vm1 }
  0xb9   : > { %v2739_v15 = vsel %vm1800_vm0, 4294967295, %v2738_v15  ;;  %v1296_v16 = vsel %vm1800_vm0, 1.0, %v1540_v8  ;;  %vm1809_vm8 = vmand %vm766_vm14, %vm2640_vm5 }
  0xba   : > { %2740 = vst [vmem:[#allocation11_spill] sm:$0xff] %v2739_v15  ;;  %v2742_v17 = vsel %vm1809_vm8, 4294967295, %v2741_v17  ;;  %v1119_v18 = vadd.f32 %v1296_v16, %v1118_v14  ;;  %v1297_v19 = vsel %vm1809_vm8, 1.0, %v1540_v8  ;;  %v1816_v20 = vpop.permute.xlu0 %696  ;;  %vm768_vm10 = vmxor %vm2642_vm15, %vm1539_vm4  ;;  %v1822_v21 = vpop.permute.xlu1 %699  ;;  %v2772_v16 = vmov 0 }
  0xbb   : > { %2743 = vst [vmem:[#allocation12_spill] sm:$0xff] %v2742_v17  ;;  %2744 = vst [vmem:[#allocation13_spill] sm:$0xff] %v1822_v21  ;;  %vm2645_vm11 = vcmp.eq.s32.totalorder %v1816_v20, 1  ;;  %vm2644_vm14 = vcmp.eq.s32.totalorder %v1822_v21, 1 }
  0xbc   : > { %vm769_vm5 = vmxor %vm2643_vm9, %vm1539_vm4  ;;  %v1120_v22 = vadd.f32 %v1297_v19, %v1119_v18  ;;  %vm2646_vm9 = vcmp.eq.s32.totalorder %v1728_v3, %v1722_v1  ;;  %v2775_v19 = vmov 0 }
  0xbd   : > { %vm1832_vm7 = vmand %vm767_vm6, %vm2645_vm11 }
  0xbe   : > { %v2746_v23 = vsel %vm1832_vm7, 4294967295, %v2745_v23  ;;  %v1298_v24 = vsel %vm1832_vm7, 1.0, %v1540_v8  ;;  %vm1841_vm15 = vmand %vm768_vm10, %vm2644_vm14  ;;  %v1847_v27 = vpop.permute.xlu0 %702  ;;  %v1849_v28 = vpop.permute.xlu1 %705 }
  0xbf   : > { %v2748_v25 = vsel %vm1841_vm15, 4294967295, %v2747_v25  ;;  %v1121_v26 = vadd.f32 %v1298_v24, %v1120_v22  ;;  %v1299_v29 = vsel %vm1841_vm15, 1.0, %v1540_v8  ;;  %vm2647_vm6 = vcmp.eq.s32.totalorder %v1847_v27, 1  ;;  %vm770_vm14 = vmxor %vm2646_vm9, %vm1539_vm4 }
  0xc0   : > { %2749 = vst [vmem:[#allocation14_spill] sm:$0xff] %v2748_v25  ;;  %vm1857_vm10 = vmand %vm769_vm5, %vm2647_vm6  ;;  %vm2648_vm11 = vcmp.eq.s32.totalorder %v1849_v28, 1 }
  0xc1   : > { %v2751_v30 = vsel %vm1857_vm10, 4294967295, %v2750_v30  ;;  %v1122_v31 = vadd.f32 %v1299_v29, %v1121_v26  ;;  %v1300_v34 = vsel %vm1857_vm10, 1.0, %v1540_v8  ;;  %vm1875_vm5 = vmand %vm770_vm14, %vm2648_vm11 }
  0xc2   : > { %2752 = vst [vmem:[#allocation15_spill] sm:$0xff] %v2751_v30  ;;  %v1866_v32 = vpop.permute.xlu0 %576  ;;  %v1868_v33 = vpop.permute.xlu1 %579  ;;  %v2755_v35 = vsel %vm1875_vm5, 4294967295, %v2754_v35  ;;  %v1301_v39 = vsel %vm1875_vm5, 1.0, %v1540_v8 }
  0xc3   : > { %2753 = vst [vmem:[#allocation16_spill] sm:$0xff] %v1866_v32  ;;  %2756 = vst [vmem:[#allocation17_spill] sm:$0xff] %v2755_v35  ;;  %v1123_v36 = vadd.f32 %v1300_v34, %v1122_v31  ;;  %vm2654_vm9 = vcmp.eq.s32.totalorder %v1866_v32, %v1722_v1  ;;  %vm2655_vm6 = vcmp.eq.s32.totalorder %v1868_v33, %v1722_v1  ;;  %v2778_v34 = vmov 0 }
  0xc4   : > { %vm771_vm11 = vmxor %vm2654_vm9, %vm1539_vm4 }
  0xc5   : > { %v1124_v40 = vadd.f32 %v1301_v39, %v1123_v36  ;;  %vm772_vm1 = vmxor %vm2655_vm6, %vm1539_vm4  ;;  %v2781_v39 = vmov 0 }
  0xc6   : > { %v1881_v37 = vpop.permute.xlu0 %582  ;;  %v1883_v38 = vpop.permute.xlu1 %585 }
  0xc7   : > { %2757 = vst [vmem:[#allocation18_spill] sm:$0xff] %v1881_v37  ;;  %vm2663_vm14 = vcmp.eq.s32.totalorder %v1881_v37, %v1722_v1  ;;  %vm2660_vm5 = vcmp.eq.s32.totalorder %v1883_v38, %v1722_v1 }
  0xc8   : > { %vm773_vm15 = vmxor %vm2663_vm14, %vm1539_vm4 }
  0xca   : > { %v1896_v41 = vpop.permute.xlu0 %708  ;;  %v1902_v42 = vpop.permute.xlu1 %711 }
  0xcb   : > { %vm2659_vm2 = vcmp.eq.s32.totalorder %v1896_v41, 1  ;;  %vm2658_vm3 = vcmp.eq.s32.totalorder %v1902_v42, 1 }
  0xcc   : > { %vm1912_vm9 = vmand %vm771_vm11, %vm2659_vm2 }
  0xcd   : > { %v2759_v43 = vsel %vm1912_vm9, 4294967295, %v2758_v43  ;;  %v1302_v44 = vsel %vm1912_vm9, 1.0, %v1540_v8  ;;  %vm1921_vm6 = vmand %vm772_vm1, %vm2658_vm3 }
  0xce   : > { %2760 = vst [vmem:[#allocation19_spill] sm:$0xff] %v2759_v43  ;;  %v2762_v45 = vsel %vm1921_vm6, 4294967295, %v2761_v45  ;;  %v1125_v46 = vadd.f32 %v1302_v44, %v1124_v40  ;;  %v1927_v47 = vpop.permute.xlu0 %714  ;;  %v1929_v48 = vpop.permute.xlu1 %717  ;;  %v1303_v49 = vsel %vm1921_vm6, 1.0, %v1540_v8  ;;  %vm774_vm3 = vmxor %vm2660_vm5, %vm1539_vm4  ;;  %v2800_v43 = vmov 0 }
  0xcf   : > { %2763 = vst [vmem:[#allocation20_spill] sm:$0xff] %v2762_v45  ;;  %vm2661_vm11 = vcmp.eq.s32.totalorder %v1927_v47, 1  ;;  %vm2662_vm2 = vcmp.eq.s32.totalorder %v1929_v48, 1 }
  0xd0   : > { %vm1937_vm1 = vmand %vm773_vm15, %vm2661_vm11  ;;  %v1126_v51 = vadd.f32 %v1303_v49, %v1125_v46 }
  0xd1   : > { %v2765_v50 = vsel %vm1937_vm1, 4294967295, %v2764_v50  ;;  %v1304_v54 = vsel %vm1937_vm1, 1.0, %v1540_v8  ;;  %vm1955_vm15 = vmand %vm774_vm3, %vm2662_vm2 }
  0xd2   : > { %2766 = vst [vmem:[#allocation21_spill] sm:$0xff] %v2765_v50  ;;  %v1946_v52 = vpop.permute.xlu0 %588  ;;  %v1948_v53 = vpop.permute.xlu1 %591  ;;  %v2769_v55 = vsel %vm1955_vm15, 4294967295, %v2768_v55  ;;  %v1127_v56 = vadd.f32 %v1304_v54, %v1126_v51  ;;  %v1305_v6 = vsel %vm1955_vm15, 1.0, %v1540_v8 }
  0xd3   : > { %2767 = vst [vmem:[#allocation22_spill] sm:$0xff] %v1948_v53  ;;  %2770 = vst [vmem:[#allocation23_spill] sm:$0xff] %v2769_v55  ;;  %vm2668_vm5 = vcmp.eq.s32.totalorder %v1946_v52, %v1722_v1  ;;  %vm2671_vm11 = vcmp.eq.s32.totalorder %v1948_v53, %v1722_v1 }
  0xd4   : > { %vm775_vm3 = vmxor %vm2668_vm5, %vm1539_vm4  ;;  %v1128_v9 = vadd.f32 %v1305_v6, %v1127_v56 }
  0xd5   : > { %vm776_vm2 = vmxor %vm2671_vm11, %vm1539_vm4 }
  0xd6   : > { %v1961_v57 = vpop.permute.xlu0 %594  ;;  %v1963_v58 = vpop.permute.xlu1 %597 }
  0xd7   : > { %vm2676_vm10 = vcmp.eq.s32.totalorder %v1961_v57, %v1722_v1  ;;  %vm2686_vm6 = vcmp.eq.s32.totalorder %v1963_v58, %v1722_v1 }
  0xda   : > { %v1974_v11 = vpop.permute.xlu0 %720  ;;  %v1980_v14 = vpop.permute.xlu1 %723 }
  0xdb   : > { %2771 = vst [vmem:[#allocation24_spill] sm:$0xff] %v1980_v14  ;;  %vm2673_vm14 = vcmp.eq.s32.totalorder %v1974_v11, 1  ;;  %vm2672_vm7 = vcmp.eq.s32.totalorder %v1980_v14, 1 }
  0xdc   : > { %vm1988_vm5 = vmand %vm775_vm3, %vm2673_vm14 }
  0xdd   : > { %v2773_v16 = vsel %vm1988_vm5, 4294967295, %v2772_v16  ;;  %v1306_v18 = vsel %vm1988_vm5, 1.0, %v1540_v8  ;;  %vm1999_vm11 = vmand %vm776_vm2, %vm2672_vm7 }
  0xde   : > { %2774 = vst [vmem:[#allocation25_spill] sm:$0xff] %v2773_v16  ;;  %v2776_v19 = vsel %vm1999_vm11, 4294967295, %v2775_v19  ;;  %v1129_v22 = vadd.f32 %v1306_v18, %v1128_v9  ;;  %v1307_v24 = vsel %vm1999_vm11, 1.0, %v1540_v8  ;;  %vm777_vm3 = vmxor %vm2676_vm10, %vm1539_vm4  ;;  %v1085_v9 = vld [vmem:[#allocation6] sm:$0x1] }
  0xdf   : > { %2777 = vst [vmem:[#allocation26_spill] sm:$0xff] %v2776_v19  ;;  %vm778_vm2 = vmxor %vm2686_vm6, %vm1539_vm4 }
  0xe0   : > { %v1130_v26 = vadd.f32 %v1307_v24, %v1129_v22  ;;  %v2010_v29 = vpop.permute.xlu0 %726  ;;  %v2016_v31 = vpop.permute.xlu1 %729 }
  0xe1   : > { %vm2687_vm7 = vcmp.eq.s32.totalorder %v2010_v29, 1  ;;  %vm2685_vm14 = vcmp.eq.s32.totalorder %v2016_v31, 1 }
  0xe2   : > { %vm2022_vm11 = vmand %vm777_vm3, %vm2687_vm7  ;;  %vm2784_vm3 = vcmp.eq.s32.totalorder %v1711_v60, %v1722_v1  ;;  %vm2786_vm7 = vcmp.eq.s32.totalorder %v1709_v59, %v1722_v1 }
  0xe3   : > { %v2779_v34 = vsel %vm2022_vm11, 4294967295, %v2778_v34  ;;  %v1308_v36 = vsel %vm2022_vm11, 1.0, %v1540_v8  ;;  %vm2031_vm10 = vmand %vm778_vm2, %vm2685_vm14  ;;  %vm2785_vm14 = vcmp.eq.s32.totalorder %v1881_v37, %v1722_v1 }
  0xe4   : > { %2780 = vst [vmem:[#allocation27_spill] sm:$0xff] %v2779_v34  ;;  %v2782_v39 = vsel %vm2031_vm10, 4294967295, %v2781_v39  ;;  %v1131_v40 = vadd.f32 %v1308_v36, %v1130_v26  ;;  %v1309_v44 = vsel %vm2031_vm10, 1.0, %v1540_v8 }
  0xe5   : > { %2783 = vst [vmem:[#allocation28_spill] sm:$0xff] %v2782_v39 }
  0xe6   : > { %v1132_v46 = vadd.f32 %v1309_v44, %v1131_v40 }
  0xe8   : > { %v1133_v49 = vrot.slane %v1132_v46, 4 }
  0xea   : > { %v1134_v51 = vadd.f32 %v1133_v49, %v1132_v46 }
  0xec   : > { %v1135_v54 = vrot.slane %v1134_v51, 2 }
  0xee   : > { %v1136_v56 = vadd.f32 %v1135_v54, %v1134_v51 }
  0xf0   : > { %v1137_v6 = vrot.slane %v1136_v56, 1 }
  0xf2   : > { %v1138_v18 = vadd.f32 %v1137_v6, %v1136_v56 }
  0xf4   : > { %v1139_v22 = vadd.f32 %v1138_v18, %v1085_v9 }
  0xf6   : > { %1140 = vst [vmem:[#allocation6] sm:$0x1] %v1139_v22 }
 0x132   : > { %v1347_v24 = vpop.f32.mrb[0].mxu0  ;;  %v1355_v19 = vpop.f32.mrb[0].mxu1 }
 0x133   : > { %v797_v14 = vmul.f32 -2.0, %v1347_v24  ;;  %v813_v25 = vmul.f32 40.0, %v1347_v24  ;;  %v471_v21 = vpop.f32.mrb[1].mxu0  ;;  %v503_v26 = vpop.f32.mrb[1].mxu1  ;;  %vm637_vm4 = vcmp.lt.f32.partialorder %v1347_v24, 1.0  ;;  %v805_v36 = vmul.f32 -2.0, %v1355_v19 }
 0x134   : > { %v821_v53 = vmul.f32 40.0, %v1355_v19  ;;  %v795_v8 = vmul.f32 -2.0, %v471_v21  ;;  %v1348_v40 = vpop.f32.mrb[2].mxu0  ;;  %v1356_v44 = vpop.f32.mrb[2].mxu1  ;;  %v811_v49 = vmul.f32 40.0, %v471_v21  ;;  %v803_v51 = vmul.f32 -2.0, %v503_v26  ;;  %vm653_vm6 = vmand %vm2784_vm3, %vm637_vm4 }
 0x135   : > { %v2041_v46 = vsel %vm2784_vm3, %v797_v14, %v813_v25  ;;  %v2043_v54 = vpop.f32.mrb[3].mxu0  ;;  %v2045_v56 = vpop.f32.mrb[3].mxu1  ;;  %vm645_vm2 = vcmp.lt.f32.partialorder %v1355_v19, 1.0  ;;  %v819_v18 = vmul.f32 40.0, %v503_v26  ;;  %v798_v19 = vmul.f32 -2.0, %v1348_v40 }
 0x136   : > { %v882_v6 = vsel %vm1800_vm0, %v2041_v46, -1e+30  ;;  %v2053_v9 = vsel %vm2785_vm14, %v805_v36, %v821_v53  ;;  %v2065_v14 = vsel %vm2786_vm7, %v795_v8, %v811_v49  ;;  %vm635_vm0 = vcmp.lt.f32.partialorder %v471_v21, 1.0 }
 0x137   : > { %v890_v25 = vsel %vm1937_vm1, %v2053_v9, -1e+30  ;;  %v880_v53 = vsel %vm1762_vm12, %v2065_v14, -1e+30  ;;  %vm2787_vm14 = vcmp.eq.s32.totalorder %v1866_v32, %v1722_v1  ;;  %vm2788_vm4 = vcmp.eq.s32.totalorder %v1881_v37, %v1722_v1 }
 0x138   : > { %v898_v22 = vmax.f32 %v882_v6, %v890_v25  ;;  %v2073_v24 = vsel %vm2787_vm14, %v803_v51, %v819_v18  ;;  %vm2078_vm3 = vmand %vm2788_vm4, %vm645_vm2  ;;  %v814_v8 = vmul.f32 40.0, %v1348_v40  ;;  %v806_v49 = vmul.f32 -2.0, %v1356_v44 }
 0x139   : > { %vm2791_vm7 = vcmp.eq.s32.totalorder %v1778_v12, 1  ;;  %v2792_v21 = vmov 0  ;;  %vm643_vm12 = vcmp.lt.f32.partialorder %v503_v26, 1.0  ;;  %v822_v25 = vmul.f32 40.0, %v1356_v44 }
 0x13a   : > { %vm2084_vm1 = vmand %vm653_vm6, %vm2791_vm7  ;;  %v902_v6 = vmax.f32 %v898_v22, %v880_v53  ;;  %v1351_v51 = vpop.f32.mrb[4].mxu0  ;;  %v2088_v18 = vpop.f32.mrb[4].mxu1  ;;  %vm2795_vm2 = vcmp.eq.s32.totalorder %v1709_v59, %v1722_v1  ;;  %v888_v12 = vsel %vm1912_vm9, %v2073_v24, -1e+30  ;;  %vm2798_vm6 = vcmp.eq.s32.totalorder %v1715_v62, %v1722_v1 }
 0x13b   : > { %v2793_v21 = vsel %vm2084_vm1, 4294967295, %v2792_v21  ;;  %vm2093_vm14 = vmand %vm2795_vm2, %vm635_vm0  ;;  %v2103_v22 = vsel %vm2798_vm6, %v798_v19, %v814_v8  ;;  %v796_v53 = vmul.f32 -2.0, %v2043_v54  ;;  %v812_v15 = vmul.f32 40.0, %v2043_v54  ;;  %v2107_v7 = vpop.f32.mrb[5].mxu0  ;;  %v2109_v37 = vpop.f32.mrb[5].mxu1 }
 0x13c   : > { %2794 = vst [vmem:[#allocation29_spill] sm:$0xff] %v2793_v21  ;;  %vm2799_vm0 = vcmp.eq.s32.totalorder %v1927_v47, 1  ;;  %v906_v60 = vmax.f32 %v902_v6, %v888_v12  ;;  %vm638_vm7 = vcmp.lt.f32.partialorder %v1348_v40, 1.0  ;;  %vm2803_vm2 = vcmp.eq.s32.totalorder %v1883_v38, %v1722_v1  ;;  %v2124_v8 = vpop.f32.mrb[6].mxu0  ;;  %v2126_v59 = vpop.f32.mrb[6].mxu1 }
 0x13d   : > { %vm2115_vm4 = vmand %vm2078_vm3, %vm2799_vm0  ;;  %v2122_v19 = vsel %vm2803_vm2, %v806_v49, %v822_v25  ;;  %vm2804_vm6 = vcmp.eq.s32.totalorder %v1866_v32, %v1722_v1  ;;  %v883_v40 = vsel %vm1809_vm8, %v2103_v22, -1e+30  ;;  %v804_v36 = vmul.f32 -2.0, %v2045_v56  ;;  %v2141_v6 = vpop.f32.mrb[7].mxu0  ;;  %v2143_v25 = vpop.f32.mrb[7].mxu1 }
 0x13e   : > { %v2801_v43 = vsel %vm2115_vm4, 4294967295, %v2800_v43  ;;  %vm2132_vm9 = vmand %vm2804_vm6, %vm643_vm12  ;;  %v820_v49 = vmul.f32 40.0, %v2045_v56  ;;  %vm2807_vm3 = vcmp.eq.s32.totalorder %v1738_v4, 1  ;;  %v896_v12 = vmax.f32 %v883_v40, %v906_v60 }
 0x13f   : > { %2802 = vst [vmem:[#allocation30_spill] sm:$0xff] %v2801_v43  ;;  %vm2149_vm12 = vmand %vm2093_vm14, %vm2807_vm3  ;;  %vm646_vm0 = vcmp.lt.f32.partialorder %v1356_v44, 1.0  ;;  %vm2810_vm2 = vcmp.eq.s32.totalorder %v1713_v61, %v1722_v1  ;;  %vm2811_vm6 = vcmp.eq.s32.totalorder %v1715_v62, %v1722_v1  ;;  %v891_v4 = vsel %vm1955_vm15, %v2122_v19, -1e+30 }
 0x140   : > { %v2156_v17 = vsel %vm2810_vm2, %v796_v53, %v812_v15  ;;  %vm2161_vm8 = vmand %vm2811_vm6, %vm638_vm7  ;;  %v801_v60 = vmul.f32 -2.0, %v1351_v51  ;;  %v817_v50 = vmul.f32 40.0, %v1351_v51  ;;  %vm2814_vm3 = vcmp.eq.s32.totalorder %v1896_v41, 1 }
 0x141   : > { %vm2173_vm2 = vmand %vm2132_vm9, %vm2814_vm3  ;;  %v2815_v15 = vmov 0  ;;  %v900_v44 = vmax.f32 %v896_v12, %v891_v4  ;;  %vm2817_vm6 = vcmp.eq.s32.totalorder %v1868_v33, %v1722_v1  ;;  %v809_v40 = vmul.f32 -2.0, %v2088_v18 }
 0x142   : > { %v2816_v15 = vsel %vm2173_vm2, 4294967295, %v2815_v15  ;;  %v2181_v53 = vsel %vm2817_vm6, %v804_v36, %v820_v49  ;;  %vm2818_vm14 = vcmp.eq.s32.totalorder %v1883_v38, %v1722_v1  ;;  %v881_v47 = vsel %vm1771_vm13, %v2156_v17, -1e+30 }
 0x143   : > { %vm2187_vm15 = vmand %vm2818_vm14, %vm646_vm0  ;;  %v825_v12 = vmul.f32 40.0, %v2088_v18  ;;  %v799_v4 = vmul.f32 -2.0, %v2107_v7  ;;  %v845_v36 = vsel %vm2084_vm1, %v2041_v46, -1e+30  ;;  %vm2821_vm3 = vcmp.eq.s32.totalorder %v1784_v13, 1 }
 0x144   : > { %vm2203_vm0 = vmand %vm2161_vm8, %vm2821_vm3  ;;  %vm2824_vm14 = vcmp.lt.f32.partialorder %v2043_v54, 1.0  ;;  %vm2825_vm6 = vcmp.eq.s32.totalorder %v1713_v61, %v1722_v1  ;;  %v904_v10 = vmax.f32 %v900_v44, %v881_v47  ;;  %vm2828_vm7 = vcmp.eq.s32.totalorder %v1726_v2, %v1722_v1 }
 0x145   : > { %vm2212_vm9 = vmand %vm2825_vm6, %vm2824_vm14  ;;  %v2219_v13 = vsel %vm2828_vm7, %v801_v60, %v817_v50  ;;  %v815_v32 = vmul.f32 40.0, %v2107_v7  ;;  %v853_v21 = vsel %vm2115_vm4, %v2053_v9, -1e+30  ;;  %vm2829_vm8 = vcmp.lt.f32.partialorder %v2045_v56, 1.0 }
 0x146   : > { %vm2830_vm3 = vcmp.eq.s32.totalorder %v1868_v33, %v1722_v1  ;;  %vm2833_vm6 = vnez %v2762_v45  ;;  %vm2834_vm1 = vcmp.eq.s32.totalorder %v1961_v57, %v1722_v1  ;;  %vm2835_vm4 = vcmp.lt.f32.partialorder %v1351_v51, 1.0  ;;  %vm2836_vm13 = vmmov %vm2828_vm7 }
 0x147   : > { %vm2230_vm14 = vmand %vm2830_vm3, %vm2829_vm8  ;;  %v889_v60 = vsel %vm2833_vm6, %v2181_v53, -1e+30  ;;  %v2241_v50 = vsel %vm2834_vm1, %v809_v40, %v825_v12  ;;  %vm2837_vm3 = vcmp.eq.s32.totalorder %v1717_v63, %v1722_v1  ;;  %v807_v47 = vmul.f32 -2.0, %v2109_v37 }
 0x148   : > { %v899_v44 = vmax.f32 %v889_v60, %v904_v10  ;;  %vm657_vm8 = vmand %vm2836_vm13, %vm2835_vm4  ;;  %v2250_v56 = vsel %vm2837_vm3, %v799_v4, %v815_v32  ;;  %v823_v43 = vmul.f32 40.0, %v2109_v37  ;;  %v843_v40 = vsel %vm2149_vm12, %v2065_v14, -1e+30 }
 0x149   : > { %vm2838_vm1 = vcmp.eq.s32.totalorder %v1929_v48, 1  ;;  %v2839_v10 = vmov 0  ;;  %vm2842_vm13 = vcmp.eq.s32.totalorder %v1847_v27, 1  ;;  %v2843_v51 = vmov 0 }
 0x14a   : > { %vm2261_vm7 = vmand %vm2187_vm15, %vm2838_vm1  ;;  %vm2845_vm3 = vnez %v2751_v30  ;;  %vm639_vm6 = vcmp.lt.f32.partialorder %v2107_v7, 1.0  ;;  %v802_v48 = vmul.f32 -2.0, %v2124_v8  ;;  %v851_v41 = vsel %vm2173_vm2, %v2073_v24, -1e+30 }
 0x14b   : > { %v2840_v10 = vsel %vm2261_vm7, 4294967295, %v2839_v10  ;;  %vm2267_vm4 = vmand %vm657_vm8, %vm2842_vm13  ;;  %v886_v12 = vsel %vm2845_vm3, %v2219_v13, -1e+30  ;;  %vm2846_vm15 = vcmp.lt.f32.partialorder %v2088_v18, 1.0  ;;  %vm2847_vm8 = vcmp.eq.s32.totalorder %v1961_v57, %v1722_v1 }
 0x14c   : > { %2841 = vst [vmem:[#allocation31_spill] sm:$0xff] %v2840_v10  ;;  %v2844_v51 = vsel %vm2267_vm4, 4294967295, %v2843_v51  ;;  %v849_v27 = vsel %vm2267_vm4, %v2219_v13, -1e+30  ;;  %v903_v4 = vmax.f32 %v899_v44, %v886_v12  ;;  %vm665_vm1 = vmand %vm2847_vm8, %vm2846_vm15  ;;  %v818_v32 = vmul.f32 40.0, %v2124_v8 }
 0x14d   : > { %vm2848_vm13 = vcmp.eq.s32.totalorder %v1740_v5, 1  ;;  %v861_v60 = vmax.f32 %v845_v36, %v849_v27  ;;  %vm2851_vm2 = vcmp.eq.s32.totalorder %v2010_v29, 1  ;;  %v2852_v44 = vmov 0 }
 0x14e   : > { %vm2292_vm3 = vmand %vm2212_vm9, %vm2848_vm13  ;;  %v894_v18 = vsel %vm2022_vm11, %v2241_v50, -1e+30  ;;  %vm2855_vm15 = vnez %v2746_v23  ;;  %vm647_vm9 = vcmp.lt.f32.partialorder %v2109_v37, 1.0  ;;  %vm2856_vm8 = vcmp.eq.s32.totalorder %v1717_v63, %v1722_v1 }
 0x14f   : > { %vm2298_vm4 = vmand %vm665_vm1, %vm2851_vm2  ;;  %v884_v5 = vsel %vm2855_vm15, %v2250_v56, -1e+30  ;;  %v907_v55 = vmax.f32 %v903_v4, %v894_v18  ;;  %vm2857_vm2 = vcmp.eq.s32.totalorder %v1946_v52, %v1722_v1  ;;  %v810_v36 = vmul.f32 -2.0, %v2126_v59 }
 0x150   : > { %v2853_v44 = vsel %vm2298_vm4, 4294967295, %v2852_v44  ;;  %vm655_vm13 = vmand %vm2856_vm8, %vm639_vm6  ;;  %v2315_v29 = vsel %vm2857_vm2, %v807_v47, %v823_v43  ;;  %v826_v12 = vmul.f32 40.0, %v2126_v59  ;;  %vm2858_vm1 = vcmp.eq.s32.totalorder %v1902_v42, 1 }
 0x151   : > { %2854 = vst [vmem:[#allocation32_spill] sm:$0xff] %v2853_v44  ;;  %vm2323_vm11 = vmand %vm2230_vm14, %vm2858_vm1  ;;  %v857_v27 = vsel %vm2298_vm4, %v2241_v50, -1e+30  ;;  %v865_v4 = vmax.f32 %v861_v60, %v853_v21  ;;  %vm2861_vm6 = vcmp.eq.s32.totalorder %v1816_v20, 1  ;;  %vm642_vm2 = vcmp.lt.f32.partialorder %v2124_v8, 1.0 }
 0x152   : > { %vm2332_vm8 = vmand %vm655_vm13, %vm2861_vm6  ;;  %vm2864_vm15 = vcmp.eq.s32.totalorder %v1728_v3, %v1722_v1  ;;  %v909_v47 = vmax.f32 %v884_v5, %v907_v55  ;;  %vm2865_vm14 = vcmp.eq.s32.totalorder %v1946_v52, %v1722_v1  ;;  %v800_v20 = vmul.f32 -2.0, %v2141_v6 }
 0x153   : > { %v2340_v42 = vsel %vm2864_vm15, %v802_v48, %v818_v32  ;;  %v847_v54 = vsel %vm2332_vm8, %v2250_v56, -1e+30  ;;  %vm663_vm1 = vmand %vm2865_vm14, %vm647_vm9  ;;  %v816_v21 = vmul.f32 40.0, %v2141_v6  ;;  %v869_v60 = vmax.f32 %v865_v4, %v857_v27 }
 0x154   : > { %v859_v8 = vmax.f32 %v843_v40, %v847_v54  ;;  %vm2866_vm13 = vcmp.eq.s32.totalorder %v1974_v11, 1  ;;  %v2867_v48 = vmov 0  ;;  %v892_v32 = vsel %vm1988_vm5, %v2315_v29, -1e+30 }
 0x155   : > { %vm2352_vm6 = vmand %vm663_vm1, %vm2866_vm13  ;;  %vm650_vm15 = vcmp.lt.f32.partialorder %v2126_v59, 1.0  ;;  %v897_v18 = vmax.f32 %v892_v32, %v909_v47  ;;  %vm2870_vm9 = vcmp.eq.s32.totalorder %v1728_v3, %v1722_v1  ;;  %vm2871_vm4 = vcmp.eq.s32.totalorder %v1963_v58, %v1722_v1 }
 0x156   : > { %v2868_v48 = vsel %vm2352_vm6, 4294967295, %v2867_v48  ;;  %vm658_vm14 = vmand %vm2870_vm9, %vm642_vm2  ;;  %v2366_v40 = vsel %vm2871_vm4, %v810_v36, %v826_v12  ;;  %v808_v11 = vmul.f32 -2.0, %v2143_v25  ;;  %v824_v5 = vmul.f32 40.0, %v2143_v25 }
 0x157   : > { %2869 = vst [vmem:[#allocation33_spill] sm:$0xff] %v2868_v48  ;;  %v846_v55 = vsel %vm2203_vm0, %v2103_v22, -1e+30  ;;  %v863_v27 = vmax.f32 %v859_v8, %v851_v41  ;;  %vm2872_vm1 = vcmp.eq.s32.totalorder %v1849_v28, 1  ;;  %vm2875_vm2 = vnez %v2755_v35  ;;  %v2454_v35 = vld [vmem:[#allocation3] sm:$0x1] }
 0x158   : > { %vm2375_vm13 = vmand %vm658_vm14, %vm2872_vm1  ;;  %v887_v36 = vsel %vm2875_vm2, %v2340_v42, -1e+30  ;;  %vm640_vm4 = vcmp.lt.f32.partialorder %v2141_v6, 1.0  ;;  %v855_v12 = vsel %vm2352_vm6, %v2315_v29, -1e+30  ;;  %vm2876_vm9 = vcmp.eq.s32.totalorder %v1963_v58, %v1722_v1 }
 0x159   : > { %v850_v41 = vsel %vm2375_vm13, %v2340_v42, -1e+30  ;;  %v901_v4 = vmax.f32 %v897_v18, %v887_v36  ;;  %vm666_vm14 = vmand %vm2876_vm9, %vm650_vm15  ;;  %vm2877_vm1 = vcmp.eq.s32.totalorder %v1719_v0, %v1722_v1  ;;  %v867_v54 = vmax.f32 %v863_v27, %v855_v12 }
 0x15a   : > { %v2395_v28 = vsel %vm2877_vm1, %v800_v20, %v816_v21  ;;  %v862_v6 = vmax.f32 %v846_v55, %v850_v41  ;;  %vm2878_vm5 = vcmp.eq.s32.totalorder %v2016_v31, 1  ;;  %v2879_v47 = vmov 0  ;;  %vm2882_vm15 = vmmov %vm2877_vm1  ;;  %v2883_v31 = vld [vmem:[#allocation22_spill] sm:$0xff]  ;;  %v2885_v55 = vld [vmem:[#allocation13_spill] sm:$0xff] }
 0x15b   : > { %vm2399_vm2 = vmand %vm666_vm14, %vm2878_vm5  ;;  %v895_v8 = vsel %vm2031_vm10, %v2366_v40, -1e+30  ;;  %vm648_vm6 = vcmp.lt.f32.partialorder %v2143_v25, 1.0  ;;  %v854_v32 = vsel %vm2261_vm7, %v2122_v19, -1e+30  ;;  %vm2884_vm5 = vcmp.eq.s32.totalorder %v2883_v31, %v1722_v1  ;;  %v2889_v25 = vld [vmem:[#allocation14_spill] sm:$0xff] }
 0x15c   : > { %v2880_v47 = vsel %vm2399_vm2, 4294967295, %v2879_v47  ;;  %v905_v20 = vmax.f32 %v901_v4, %v895_v8  ;;  %vm656_vm9 = vmand %vm2882_vm15, %vm640_vm4  ;;  %v2416_v21 = vsel %vm2884_vm5, %v808_v11, %v824_v5  ;;  %v866_v18 = vmax.f32 %v862_v6, %v854_v32  ;;  %v2892_v8 = vld [vmem:[#allocation24_spill] sm:$0xff] }
 0x15d   : > { %2881 = vst [vmem:[#allocation34_spill] sm:$0xff] %v2880_v47  ;;  %vm2886_vm14 = vcmp.eq.s32.totalorder %v2885_v55, 1  ;;  %vm2890_vm10 = vnez %v2889_v25  ;;  %v844_v12 = vsel %vm2292_vm3, %v2156_v17, -1e+30  ;;  %v858_v11 = vsel %vm2399_vm2, %v2366_v40, -1e+30  ;;  %vm2891_vm4 = vmmov %vm2884_vm5 }
 0x15e   : > { %vm2420_vm1 = vmand %vm656_vm9, %vm2886_vm14  ;;  %v885_v36 = vsel %vm2890_vm10, %v2395_v28, -1e+30  ;;  %v870_v4 = vmax.f32 %v866_v18, %v858_v11  ;;  %vm2893_vm9 = vcmp.eq.s32.totalorder %v2892_v8, 1  ;;  %v2896_v55 = vld [vmem:[#allocation26_spill] sm:$0xff]  ;;  %v928_v30 = vlaneseq }
 0x15f   : > { %v848_v5 = vsel %vm2420_vm1, %v2395_v28, -1e+30  ;;  %v908_v41 = vmax.f32 %v885_v36, %v905_v20  ;;  %vm664_vm15 = vmand %vm2891_vm4, %vm648_vm6  ;;  %vm2897_vm14 = vnez %v2896_v55  ;;  %v852_v20 = vsel %vm2323_vm11, %v2181_v53, -1e+30 }
 0x160   : > { %v860_v6 = vmax.f32 %v844_v12, %v848_v5  ;;  %vm2441_vm5 = vmand %vm664_vm15, %vm2893_vm9  ;;  %v893_v39 = vsel %vm2897_vm14, %v2416_v21, -1e+30  ;;  %v872_v47 = vmax.f32 %v869_v60, %v870_v4  ;;  %vm2900_vm4 = vcmp.eq.s32.totalorder %v1713_v61, %v1722_v1 }
 0x161   : > { %v910_v36 = vmax.f32 %v908_v41, %v893_v39  ;;  %v856_v18 = vsel %vm2441_vm5, %v2416_v21, -1e+30  ;;  %vm2903_vm9 = vcmp.eq.s32.totalorder %v1715_v62, %v1722_v1  ;;  %vm2904_vm2 = vcmp.eq.s32.totalorder %v1717_v63, %v1722_v1 }
 0x162   : > { %v864_v34 = vmax.f32 %v860_v6, %v852_v20  ;;  %v929_v6 = vshrl.u32 %v928_v30, 7  ;;  %vm2905_vm14 = vcmp.eq.s32.totalorder %v1719_v0, %v1722_v1 }
 0x163   : > { %v911_v12 = vrot.slane %v910_v36, 4 }
 0x164   : > { %v868_v11 = vmax.f32 %v864_v34, %v856_v18 }
 0x165   : > { %v912_v5 = vmax.f32 %v910_v36, %v911_v12 }
 0x166   : > { %v871_v8 = vmax.f32 %v867_v54, %v868_v11  ;;  %v2460_v54 = vld [vmem:[#allocation2] sm:$0x1] }
 0x167   : > { %v913_v44 = vrot.slane %v912_v5, 2 }
 0x168   : > { %v873_v16 = vmax.f32 %v871_v8, %v872_v47  ;;  %v2908_v8 = vld [vmem:[#allocation16_spill] sm:$0xff] }
 0x169   : > { %v914_v48 = vmax.f32 %v912_v5, %v913_v44  ;;  %v930_v44 = vsub.s32 0, %v929_v6 }
 0x16a   : > { %v874_v55 = vrot.slane %v873_v16, 4 }
 0x16b   : > { %v915_v10 = vrot.slane %v914_v48, 1 }
 0x16c   : > { %v875_v45 = vmax.f32 %v873_v16, %v874_v55  ;;  %v2901_v55 = vld [vmem:[#allocation8_spill] sm:$0xff] }
 0x16d   : > { %v916_v39 = vmax.f32 %v914_v48, %v915_v10  ;;  %v2898_v48 = vld [vmem:[#allocation7_spill] sm:$0xff]  ;;  %vm2902_vm15 = vcmp.eq.s32.totalorder %v2901_v55, %v1722_v1  ;;  %v2918_v55 = vld [vmem:[#allocation9_spill] sm:$0xff] }
 0x16e   : > { %v876_v60 = vrot.slane %v875_v45, 2  ;;  %vm2899_vm6 = vcmp.eq.s32.totalorder %v2898_v48, %v1722_v1 }
 0x16f   : > { %v2457_v41 = vmax.f32 %v2454_v35, %v916_v39  ;;  %v2911_v39 = vld [vmem:[#allocation18_spill] sm:$0xff] }
 0x170   : > { %v877_v4 = vmax.f32 %v875_v45, %v876_v60 }
 0x171   : > { %1142 = vst [vmem:[#allocation3] sm:$0x1] %v2457_v41  ;;  %v937_v16 = vrot.slane %v2457_v41, %v930_v44 }
 0x172   : > { %v878_v34 = vrot.slane %v877_v4, 1 }
 0x174   : > { %v879_v47 = vmax.f32 %v877_v4, %v878_v34 }
 0x176   : > { %v2463_v20 = vmax.f32 %v2460_v54, %v879_v47 }
 0x178   : > { %v931_v10 = vrot.slane %v2463_v20, %v930_v44  ;;  %1141 = vst [vmem:[#allocation2] sm:$0x1] %v2463_v20 }
 0x17a   : > { %v939_v30 = vsel %vm2899_vm6, %v931_v10, %v937_v16  ;;  %v940_v45 = vsel %vm2900_vm4, %v931_v10, %v937_v16  ;;  %v941_v36 = vsel %vm2902_vm15, %v931_v10, %v937_v16  ;;  %v942_v18 = vsel %vm2903_vm9, %v931_v10, %v937_v16 }
 0x17b   : > { %v943_v12 = vsel %vm2904_vm2, %v931_v10, %v937_v16  ;;  %v944_v11 = vsel %vm2905_vm14, %v931_v10, %v937_v16  ;;  %vm2906_vm6 = vcmp.eq.s32.totalorder %v1726_v2, %v1722_v1  ;;  %vm2907_vm4 = vcmp.eq.s32.totalorder %v1728_v3, %v1722_v1 }
 0x17c   : > { %v945_v61 = vsel %vm2906_vm6, %v931_v10, %v937_v16  ;;  %v946_v5 = vsel %vm2907_vm4, %v931_v10, %v937_v16  ;;  %vm2909_vm15 = vcmp.eq.s32.totalorder %v2908_v8, %v1722_v1  ;;  %vm2910_vm9 = vcmp.eq.s32.totalorder %v1868_v33, %v1722_v1 }
 0x17d   : > { %v947_v62 = vsel %vm2909_vm15, %v931_v10, %v937_v16  ;;  %v948_v63 = vsel %vm2910_vm9, %v931_v10, %v937_v16  ;;  %vm2912_vm2 = vcmp.eq.s32.totalorder %v2911_v39, %v1722_v1  ;;  %vm2913_vm14 = vcmp.eq.s32.totalorder %v1883_v38, %v1722_v1 }
 0x17e   : > { %v949_v0 = vsel %vm2912_vm2, %v931_v10, %v937_v16  ;;  %v950_v2 = vsel %vm2913_vm14, %v931_v10, %v937_v16  ;;  %vm2914_vm6 = vcmp.eq.s32.totalorder %v1946_v52, %v1722_v1  ;;  %vm2915_vm4 = vcmp.eq.s32.totalorder %v2883_v31, %v1722_v1 }
 0x17f   : > { %v951_v3 = vsel %vm2914_vm6, %v931_v10, %v937_v16  ;;  %v952_v60 = vsel %vm2915_vm4, %v931_v10, %v937_v16  ;;  %vm2916_vm15 = vcmp.eq.s32.totalorder %v1961_v57, %v1722_v1  ;;  %vm2917_vm9 = vcmp.eq.s32.totalorder %v1963_v58, %v1722_v1 }
 0x180   : > { %v2513_v33 = vsel %vm2916_vm15, %v931_v10, %v937_v16  ;;  %v2518_v4 = vsel %vm2917_vm9, %v931_v10, %v937_v16  ;;  %v955_v38 = vsub.f32 %v2065_v14, %v939_v30  ;;  %v956_v6 = vsub.f32 %v2156_v17, %v940_v45 }
 0x181   : > { %v957_v52 = vsub.f32 %v2041_v46, %v941_v36  ;;  %v958_v34 = vsub.f32 %v2103_v22, %v942_v18  ;;  %v959_v31 = vsub.f32 %v2250_v56, %v943_v12  ;;  %v960_v47 = vsub.f32 %v2395_v28, %v944_v11  ;;  %v2920_v11 = vld [vmem:[#allocation10_spill] sm:$0xff] }
 0x182   : > { %v961_v57 = vsub.f32 %v2219_v13, %v945_v61  ;;  %v962_v44 = vsub.f32 %v2340_v42, %v946_v5  ;;  %v963_v1 = vsub.f32 %v2073_v24, %v947_v62  ;;  %v964_v58 = vsub.f32 %v2181_v53, %v948_v63  ;;  %v2922_v62 = vld [vmem:[#allocation29_spill] sm:$0xff] }
 0x183   : > { %v965_v14 = vsub.f32 %v2053_v9, %v949_v0  ;;  %v966_v17 = vsub.f32 %v2122_v19, %v950_v2  ;;  %v967_v46 = vsub.f32 %v2315_v29, %v951_v3  ;;  %v968_v22 = vsub.f32 %v2416_v21, %v952_v60 }
 0x184   : > { %v969_v56 = vsub.f32 %v2241_v50, %v2513_v33  ;;  %v970_v13 = vsub.f32 %v2366_v40, %v2518_v4  ;;  %v971_v28 = vmul.f32 1.442695, %v955_v38  ;;  %v973_v42 = vmul.f32 1.442695, %v956_v6  ;;  %v2924_v38 = vld [vmem:[#allocation11_spill] sm:$0xff] }
 0x185   : > { %v975_v16 = vmul.f32 1.442695, %v957_v52  ;;  %v977_v24 = vmul.f32 1.442695, %v958_v34  ;;  %v979_v53 = vmul.f32 1.442695, %v959_v31  ;;  %vm2919_vm2 = vnez %v2918_v55 }
 0x186   : > { %1456 = vpow2.f32 %v971_v28  ;;  %v981_v9 = vmul.f32 1.442695, %v960_v47  ;;  %v983_v19 = vmul.f32 1.442695, %v961_v57  ;;  %v985_v29 = vmul.f32 1.442695, %v962_v44 }
 0x187   : > { %1458 = vpow2.f32 %v973_v42  ;;  %v987_v21 = vmul.f32 1.442695, %v963_v1  ;;  %v989_v10 = vmul.f32 1.442695, %v964_v58  ;;  %v997_v50 = vmul.f32 1.442695, %v968_v22 }
 0x188   : > { %1460 = vpow2.f32 %v975_v16  ;;  %vm2921_vm14 = vnez %v2920_v11  ;;  %v991_v8 = vmul.f32 1.442695, %v965_v14  ;;  %vm2923_vm6 = vnez %v2922_v62  ;;  %v2927_v1 = vld [vmem:[#allocation12_spill] sm:$0xff] }
 0x189   : > { %1462 = vpow2.f32 %v977_v24  ;;  %v993_v60 = vmul.f32 1.442695, %v966_v17  ;;  %v995_v34 = vmul.f32 1.442695, %v967_v46  ;;  %v999_v16 = vmul.f32 1.442695, %v969_v56 }
 0x18a   : > { %1464 = vpow2.f32 %v979_v53 }
 0x18b   : > { %1466 = vpow2.f32 %v981_v9 }
 0x18c   : > { %1468 = vpow2.f32 %v983_v19 }
 0x18d   : > { %1470 = vpow2.f32 %v985_v29  ;;  %v2931_v29 = vld [vmem:[#allocation15_spill] sm:$0xff] }
 0x18e   : > { %1472 = vpow2.f32 %v987_v21 }
 0x18f   : > { %1474 = vpow2.f32 %v989_v10  ;;  %v2933_v10 = vld [vmem:[#allocation17_spill] sm:$0xff] }
 0x190   : > { %v1457_v48 = vpop.eup %1456  ;;  %1476 = vpow2.f32 %v997_v50 }
 0x191   : > { %v1459_v30 = vpop.eup %1458  ;;  %v1005_v45 = vsel %vm2149_vm12, %v1457_v48, 0.0  ;;  %v1046_v36 = vsel %vm2919_vm2, %v1457_v48, 0.0  ;;  %vm2925_vm12 = vnez %v2924_v38  ;;  %1478 = vpow2.f32 %v991_v8  ;;  %v2941_v8 = vld [vmem:[#allocation21_spill] sm:$0xff] }
 0x192   : > { %v1461_v18 = vpop.eup %1460  ;;  %v1006_v12 = vsel %vm2292_vm3, %v1459_v30, 0.0  ;;  %v1047_v61 = vsel %vm2921_vm14, %v1459_v30, 0.0  ;;  %vm2928_vm3 = vnez %v2927_v1  ;;  %1480 = vpow2.f32 %v993_v60  ;;  %v2944_v60 = vld [vmem:[#allocation23_spill] sm:$0xff]  ;;  %v2950_v1 = vld [vmem:[#allocation26_spill] sm:$0xff] }
 0x193   : > { %v1463_v5 = vpop.eup %1462  ;;  %v1007_v63 = vsel %vm2923_vm6, %v1461_v18, 0.0  ;;  %v1021_v39 = vadd.f32 %v1006_v12, %v1005_v45  ;;  %v1062_v2 = vadd.f32 %v1047_v61, %v1046_v36  ;;  %v1048_v6 = vsel %vm2925_vm12, %v1461_v18, 0.0  ;;  %v2935_v45 = vld [vmem:[#allocation19_spill] sm:$0xff]  ;;  %v2937_v36 = vld [vmem:[#allocation20_spill] sm:$0xff]  ;;  %v2939_v18 = vld [vmem:[#allocation30_spill] sm:$0xff] }
 0x194   : > { %v1465_v0 = vpop.eup %1464  ;;  %v1008_v26 = vsel %vm2203_vm0, %v1463_v5, 0.0  ;;  %vm2926_vm0 = vnez %v2844_v51  ;;  %v1049_v43 = vsel %vm2928_vm3, %v1463_v5, 0.0  ;;  %1482 = vpow2.f32 %v995_v34 }
 0x195   : > { %v1467_v3 = vpop.eup %1466  ;;  %v1009_v7 = vsel %vm2332_vm8, %v1465_v0, 0.0  ;;  %v1022_v33 = vadd.f32 %v1021_v39, %v1007_v63  ;;  %v1063_v47 = vadd.f32 %v1062_v2, %v1048_v6  ;;  %vm2929_vm8 = vnez %v2816_v15 }
 0x196   : > { %v1469_v52 = vpop.eup %1468  ;;  %v1010_v31 = vsel %vm2420_vm1, %v1467_v3, 0.0  ;;  %vm2930_vm1 = vnez %v2746_v23  ;;  %v1051_v59 = vsel %vm2890_vm10, %v1467_v3, 0.0  ;;  %v1001_v15 = vmul.f32 1.442695, %v970_v13 }
 0x197   : > { %v1471_v57 = vpop.eup %1470  ;;  %v1011_v49 = vsel %vm2926_vm0, %v1469_v52, 0.0  ;;  %v1023_v44 = vadd.f32 %v1022_v33, %v1008_v26  ;;  %v1064_v17 = vadd.f32 %v1063_v47, %v1049_v43  ;;  %v1050_v28 = vsel %vm2930_vm1, %v1465_v0, 0.0  ;;  %v2946_v33 = vld [vmem:[#allocation33_spill] sm:$0xff] }
 0x198   : > { %v1473_v58 = vpop.eup %1472  ;;  %v1012_v14 = vsel %vm2375_vm13, %v1471_v57, 0.0  ;;  %vm2932_vm13 = vnez %v2931_v29  ;;  %1484 = vpow2.f32 %v999_v16  ;;  %vm2936_vm10 = vnez %v2935_v45 }
 0x199   : > { %v1475_v22 = vpop.eup %1474  ;;  %v1013_v27 = vsel %vm2929_vm8, %v1473_v58, 0.0  ;;  %v1024_v46 = vadd.f32 %v1023_v44, %v1009_v7  ;;  %v1065_v42 = vadd.f32 %v1064_v17, %v1050_v28  ;;  %v1052_v23 = vsel %vm2932_vm13, %v1469_v52, 0.0  ;;  %v2954_v17 = vld [vmem:[#allocation27_spill] sm:$0xff] }
 0x19a   : > { %v1014_v51 = vsel %vm2323_vm11, %v1475_v22, 0.0  ;;  %v1477_v9 = vpop.eup %1476  ;;  %vm2934_vm11 = vnez %v2933_v10  ;;  %1486 = vpow2.f32 %v1001_v15  ;;  %v1054_v40 = vsel %vm2936_vm10, %v1473_v58, 0.0 }
 0x19b   : > { %v1025_v24 = vadd.f32 %v1024_v46, %v1010_v31  ;;  %v1066_v53 = vadd.f32 %v1065_v42, %v1051_v59  ;;  %v1018_v37 = vsel %vm2441_vm5, %v1477_v9, 0.0  ;;  %v1053_v25 = vsel %vm2934_vm11, %v1471_v57, 0.0  ;;  %v1479_v48 = vpop.eup %1478  ;;  %v2948_v31 = vld [vmem:[#allocation25_spill] sm:$0xff]  ;;  %v2958_v42 = vld [vmem:[#allocation28_spill] sm:$0xff] }
 0x19c   : > { %v1481_v13 = vpop.eup %1480  ;;  %vm2938_vm4 = vnez %v2937_v36  ;;  %vm2940_vm5 = vnez %v2939_v18  ;;  %vm2942_vm15 = vnez %v2941_v8  ;;  %v921_v63 = vsub.f32 %v2460_v54, %v2463_v20  ;;  %v1158_v8 = vld [vmem:[#allocation6] sm:$0x1] (!%p1310_p9) }
 0x19d   : > { %v1026_v19 = vadd.f32 %v1025_v24, %v1011_v49  ;;  %v1067_v21 = vadd.f32 %v1066_v53, %v1052_v23  ;;  %v1055_v32 = vsel %vm2938_vm4, %v1475_v22, 0.0  ;;  %v1015_v12 = vsel %vm2940_vm5, %v1479_v48, 0.0 }
 0x19e   : > { %v1483_v61 = vpop.eup %1482  ;;  %v1056_v62 = vsel %vm2942_vm15, %v1479_v48, 0.0  ;;  %v1016_v0 = vsel %vm2261_vm7, %v1481_v13, 0.0  ;;  %v924_v2 = vsub.f32 %v2454_v35, %v2457_v41  ;;  %vm2945_vm9 = vnez %v2944_v60  ;;  %v2952_v41 = vld [vmem:[#allocation32_spill] sm:$0xff] }
 0x19f   : > { %v1027_v56 = vadd.f32 %v1026_v19, %v1012_v14  ;;  %v1068_v50 = vadd.f32 %v1067_v21, %v1053_v25  ;;  %v1057_v7 = vsel %vm2945_vm9, %v1481_v13, 0.0  ;;  %vm2947_vm2 = vnez %v2946_v33  ;;  %v1003_v21 = vld [vmem:[#allocation4] sm:$0x1] }
 0x1a0   : > { %v1017_v38 = vsel %vm2947_vm2, %v1483_v61, 0.0  ;;  %vm2949_vm14 = vnez %v2948_v31  ;;  %v922_v20 = vmul.f32 1.442695, %v921_v63  ;;  %v925_v49 = vmul.f32 1.442695, %v924_v2 }
 0x1a1   : > { %v1028_v30 = vadd.f32 %v1027_v56, %v1013_v27  ;;  %v1069_v4 = vadd.f32 %v1068_v50, %v1054_v40  ;;  %v1058_v54 = vsel %vm2949_vm14, %v1483_v61, 0.0  ;;  %vm2951_vm7 = vnez %v2950_v1  ;;  %v2956_v27 = vld [vmem:[#allocation34_spill] sm:$0xff] }
 0x1a2   : > { %v1485_v52 = vpop.eup %1484  ;;  %v1059_v35 = vsel %vm2951_vm7, %v1477_v9, 0.0  ;;  %vm2953_vm6 = vnez %v2952_v41  ;;  %vm2955_vm12 = vnez %v2954_v17  ;;  %1488 = vpow2.f32 %v922_v20  ;;  %v1044_v50 = vld [vmem:[#allocation5] sm:$0x1] }
 0x1a3   : > { %v1029_v55 = vadd.f32 %v1028_v30, %v1014_v51  ;;  %v1070_v11 = vadd.f32 %v1069_v4, %v1055_v32  ;;  %v1019_v43 = vsel %vm2953_vm6, %v1485_v52, 0.0  ;;  %v1060_v22 = vsel %vm2955_vm12, %v1485_v52, 0.0 }
 0x1a4   : > { %v1487_v57 = vpop.eup %1486  ;;  %vm2957_vm0 = vnez %v2956_v27  ;;  %1490 = vpow2.f32 %v925_v49  ;;  %vm2959_vm3 = vnez %v2958_v42  ;;  %vm1159_vm8 = vcmp.gt.f32.partialorder (!%p1310_p9), %v1158_v8, 0.0 }
 0x1a5   : > { %v1030_v5 = vadd.f32 %v1029_v55, %v1015_v12  ;;  %v1071_v26 = vadd.f32 %v1070_v11, %v1056_v62  ;;  %v1020_v46 = vsel %vm2957_vm0, %v1487_v57, 0.0  ;;  %v1061_v16 = vsel %vm2959_vm3, %v1487_v57, 0.0  ;;  %v1147_v12 = vld [vmem:[#allocation2] sm:$0x1] (!%p1310_p9)  ;;  %v1152_v11 = vld [vmem:[#allocation3] sm:$0x1] (!%p1310_p9) }
 0x1a6   : > { %v1160_v62 = vld [vmem:[%s1620_s12] sm:$0x1] (!%p1310_p9) }
 0x1a7   : > { %v1031_v3 = vadd.f32 %v1030_v5, %v1016_v0  ;;  %v1072_v6 = vadd.f32 %v1071_v26, %v1057_v7  ;;  %vm1161_vm1 = vcmp.ge.s32.totalorder (!%p1310_p9), %v1160_v62, 0 }
 0x1a8   : > { %vm1162_vm13 = vmand (!%p1310_p9), %vm1159_vm8, %vm1161_vm1 }
 0x1a9   : > { %v1032_v34 = vadd.f32 %v1031_v3, %v1017_v38  ;;  %v1073_v47 = vadd.f32 %v1072_v6, %v1058_v54 }
 0x1ab   : > { %v1033_v44 = vadd.f32 %v1032_v34, %v1018_v37  ;;  %v1074_v58 = vadd.f32 %v1073_v47, %v1059_v35 }
 0x1ac   : > { %v1489_v37 = vpop.eup %1488 }
 0x1ad   : > { %v1034_v14 = vadd.f32 %v1033_v44, %v1019_v43  ;;  %v1075_v28 = vadd.f32 %v1074_v58, %v1060_v22  ;;  %v1004_v30 = vmul.f32 %v1489_v37, %v1003_v21 }
 0x1ae   : > { %v1491_v10 = vpop.eup %1490 }
 0x1af   : > { %v1035_v51 = vadd.f32 %v1034_v14, %v1020_v46  ;;  %v1076_v24 = vadd.f32 %v1075_v28, %v1061_v16  ;;  %v1045_v40 = vmul.f32 %v1491_v10, %v1044_v50 }
 0x1b1   : > { %v1036_v59 = vrot.slane %v1035_v51, 4  ;;  %v1077_v53 = vrot.slane %v1076_v24, 4 }
 0x1b3   : > { %v1037_v9 = vadd.f32 %v1036_v59, %v1035_v51  ;;  %v1078_v15 = vadd.f32 %v1077_v53, %v1076_v24 }
 0x1b5   : > { %v1038_v19 = vrot.slane %v1037_v9, 2  ;;  %v1079_v29 = vrot.slane %v1078_v15, 2 }
 0x1b7   : > { %v1039_v23 = vadd.f32 %v1038_v19, %v1037_v9  ;;  %v1080_v56 = vadd.f32 %v1079_v29, %v1078_v15 }
 0x1b9   : > { %v1040_v25 = vrot.slane %v1039_v23, 1  ;;  %v1081_v48 = vrot.slane %v1080_v56, 1  ;;  %1146 = sbr.rel (%p1310_p9) target bundleno = 477 (0x1dd), region = 44 }
 0x1bb   : > { %v1041_v45 = vadd.f32 %v1040_v25, %v1039_v23  ;;  %v1082_v4 = vadd.f32 %v1081_v48, %v1080_v56 }
 0x1bd   : > { %v1042_v13 = vadd.f32 %v1041_v45, %v1004_v30  ;;  %v1083_v55 = vadd.f32 %v1082_v4, %v1045_v40 }
 0x1bf   : > { %1043 = vst [vmem:[#allocation4] sm:$0x1] %v1042_v13  ;;  %1084 = vst [vmem:[#allocation5] sm:$0x1] %v1083_v55 }
 0x1c6   : > { %v1148_v36 = vld [vmem:[#allocation4] sm:$0x1]  ;;  %v1153_v32 = vld [vmem:[#allocation5] sm:$0x1] }
 0x1c7   : > { %1492 = vlog2.f32 %v1148_v36 }
 0x1c8   : > { %1494 = vlog2.f32 %v1153_v32 }
 0x1d1   : > { %v1493_v18 = vpop.eup %1492 }
 0x1d2   : > { %v1495_v61 = vpop.eup %1494  ;;  %v1150_v5 = vmul.f32 0.6931472, %v1493_v18 }
 0x1d3   : > { %v1155_v63 = vmul.f32 0.6931472, %v1495_v61 }
 0x1d4   : > { %v1151_v39 = vadd.f32 %v1150_v5, %v1147_v12 }
 0x1d5   : > { %v1156_v0 = vadd.f32 %v1155_v63, %v1152_v11 }
 0x1d7   : > { %v1157_v26 = vmul.f32 0.05, %v1156_v0 }
 0x1d9   : > { %v1163_v2 = vadd.f32 %v1157_v26, %v1151_v39 }
 0x1db   : > { %v1164_v3 = vsel %vm1162_vm13, %v1163_v2, 0.0 }
 0x1dc   : > { %1165 = vst [vmem:[%s265_s22] sm:$0x1] %v1164_v3 }
 0x1dd PF: > { %s14_s19 = sadd.s32 1, %s1534_s19   ;;  %s2960_s15 = smov %s1526_s17 }
 0x1de   : > { %p11_p10 = scmp.ge.s32.totalorder %s14_s19, 6   ;;  %s2961_s16 = smov %s1530_s18 }
 0x1df   : > { %s2962_s17 = smov %s2965_s20  ;;  %s2963_s18 = smov %s2969_s21 }
 0x1e0   :  { %13 = sbr.rel (!%p11_p10) target bundleno = 3 (0x3), region = 83 }

</bundles_post_ra>
